<compile_context>
chip_gen: v7x
topology: tpu7x:2x2x1
jax: 0.10.0
libtpu: 0.0.40
codegen_flags: <defaults>
</compile_context>

<pallas_src>
import jax
import jax.numpy as jnp
import numpy as np
from jax import lax
from jax.experimental import pallas as pl
from jax.experimental.pallas import tpu as pltpu

LANE = 128
CHUNK_ROWS = 8  # one f32 vreg of rows per per-channel chunk


def _round_up(a, b):
    return (a + b - 1) // b * b


def _cdiv(a, b):
    return (a + b - 1) // b


def _attention_gate_kernel(g_ref, x_ref, wg_ref, bg_ref, wx_ref, wa_ref, ba_ref,
                           out_ref):
    """One (batch, row-tile) grid step.

    Layout: pixels packed on sublanes AND lanes.
      g_ref:  (Cg, R, 128) VMEM      x_ref:  (Cx, R, 128) VMEM
      wg_ref: (Ci, Cg) SMEM          bg_ref: (Ci,)   SMEM
      wx_ref: (Ci, Cx) SMEM
      wa_ref: (Ca, Ci) SMEM          ba_ref: (Ca,)   SMEM   (Ca == 1 or Cx)
      out_ref:(Cx, R, 128) VMEM
    The 1x1 convs (C <= 8) are unrolled scalar-weight * tile FMAs on the VPU
    (no MXU), processed in one-vreg (8,128) pixel chunks so intermediates stay
    in vregs.
    """
    cg, R, _ = g_ref.shape
    cx = x_ref.shape[0]
    ci = wg_ref.shape[0]
    ca = wa_ref.shape[0]

    # Hoist every weight/bias scalar out of the pixel-chunk loop (SMEM reads
    # happen once; they stay loop-invariant in sregs).
    wg = [[wg_ref[i, c] for c in range(cg)] for i in range(ci)]
    bg = [bg_ref[i] for i in range(ci)]
    wx = [[wx_ref[i, c] for c in range(cx)] for i in range(ci)]
    wa = [[wa_ref[a, i] for i in range(ci)] for a in range(ca)]
    ba = [ba_ref[a] for a in range(ca)]

    def process(r0, nrows):
        # Dense (C, nrows, 128) chunks; per-channel slices are full vreg tiles.
        g = g_ref[:, pl.ds(r0, nrows), :].astype(jnp.float32)
        x = x_ref[:, pl.ds(r0, nrows), :].astype(jnp.float32)

        # Fused: logit[a] = b_a[a] + sum_i w_a[a,i] * relu(g_c[i] + x_c[i])
        logits = [None] * ca
        for i in range(ci):
            acc = bg[i] + wg[i][0] * g[0]
            for c in range(1, cg):
                acc = acc + wg[i][c] * g[c]
            for c in range(cx):
                acc = acc + wx[i][c] * x[c]
            r = jnp.maximum(acc, 0.0)                      # ReLU, (nrows, 128)
            for a in range(ca):
                t = wa[a][i] * r
                logits[a] = t if logits[a] is None else logits[a] + t

        # sigmoid via EUP tanh: sigmoid(z) = 0.5 * tanh(z / 2) + 0.5
        if ca == 1:
            alpha = 0.5 * jnp.tanh(0.5 * (logits[0] + ba[0])) + 0.5
            for c in range(cx):
                out_ref[c, pl.ds(r0, nrows), :] = (alpha * x[c]).astype(out_ref.dtype)
        else:  # mask_channel_wise=True: one alpha tile per x channel.
            for a in range(ca):
                alpha_a = 0.5 * jnp.tanh(0.5 * (logits[a] + ba[a])) + 0.5
                out_ref[a, pl.ds(r0, nrows), :] = (alpha_a * x[a]).astype(out_ref.dtype)

    n_full = R // CHUNK_ROWS
    rem = R - n_full * CHUNK_ROWS

    if n_full > 0:
        def body(step, carry):
            process(pl.multiple_of(step * CHUNK_ROWS, CHUNK_ROWS), CHUNK_ROWS)
            return carry
        lax.fori_loop(0, n_full, body, 0)
    if rem > 0:
        process(n_full * CHUNK_ROWS, rem)


def attention_gate(g, x, params, *, vmem_block_budget=16 << 20):
    """AttentionGate forward. g: (B, Cg, H, W), x: (B, Cx, H, W), same spatial size.

    params (PyTorch 1x1-conv layout, no transposes needed):
      w_g: (Ci, Cg)   b_g: (Ci,)
      w_x: (Ci, Cx)
      w_a: (Ca, Ci)   b_a: (Ca,)    Ca = 1 (default) or Cx (mask_channel_wise)
    """
    B, Cg, H, W = g.shape
    Bx, Cx, Hx, Wx = x.shape
    # TODO(synk): bilinear F.interpolate branch (only hit when g/x spatial sizes
    # differ) is not implemented; sizes are equal here as in typical usage.
    assert B == Bx and (H, W) == (Hx, Wx), "interpolation path not implemented"
    Ci = params["w_g"].shape[0]
    Ca = params["w_a"].shape[0]
    assert params["w_g"].shape == (Ci, Cg)
    assert params["w_x"].shape == (Ci, Cx)
    assert params["w_a"].shape == (Ca, Ci) and Ca in (1, Cx)

    P = H * W
    rows = _cdiv(P, LANE)

    # Tile sizing: big row tiles bounded by a VMEM budget (double-buffered
    # g + x + out blocks, f32), amortizing per-grid-step overhead.
    bytes_per_row = LANE * 4 * (Cg + 2 * Cx)
    max_rows = max(CHUNK_ROWS, vmem_block_budget // (2 * bytes_per_row))
    n_tiles = _cdiv(rows, max_rows)
    if B * n_tiles < 2 and rows >= 2 * CHUNK_ROWS:
        n_tiles = 2          # keep >=2 grid steps so both v7x TensorCores get work
    tile_rows = _cdiv(rows, n_tiles)
    if n_tiles > 1:
        tile_rows = _round_up(tile_rows, CHUNK_ROWS)   # (8,128) block constraint
    rows_p = n_tiles * tile_rows
    Pp = rows_p * LANE

    # Free reshapes: NCHW -> (B, C, rows, 128). Padding (and the matching output
    # slice) only happens when P isn't already tile-aligned; typical power-of-two
    # spatial sizes take the copy-free path.
    g_r = g.reshape(B, Cg, P)
    x_r = x.reshape(B, Cx, P)
    if Pp != P:
        g_r = jnp.pad(g_r, ((0, 0), (0, 0), (0, Pp - P)))
        x_r = jnp.pad(x_r, ((0, 0), (0, 0), (0, Pp - P)))
    g_r = g_r.reshape(B, Cg, rows_p, LANE)
    x_r = x_r.reshape(B, Cx, rows_p, LANE)

    wg = params["w_g"].astype(jnp.float32)
    bg = params["b_g"].reshape(Ci).astype(jnp.float32)
    wx = params["w_x"].astype(jnp.float32)
    wa = params["w_a"].astype(jnp.float32)
    ba = params["b_a"].reshape(Ca).astype(jnp.float32)

    grid = (B, n_tiles)

    # Explicit VMEM budget from the actual (double-buffered) block footprint,
    # capped at 48 MiB so v7x's 64 MiB physical VMEM keeps headroom.
    itemsize = jnp.dtype(x.dtype).itemsize
    block_bytes = itemsize * tile_rows * LANE * (Cg + 2 * Cx)
    vmem_limit = int(min(48 << 20, max(4 << 20, 3 * block_bytes)))

    out_r = pl.pallas_call(
        _attention_gate_kernel,
        out_shape=jax.ShapeDtypeStruct((B, Cx, rows_p, LANE), x.dtype),
        grid_spec=pltpu.PrefetchScalarGridSpec(
            num_scalar_prefetch=0,
            grid=grid,
            in_specs=[
                pl.BlockSpec((None, Cg, tile_rows, LANE), lambda b, t: (b, 0, t, 0)),
                pl.BlockSpec((None, Cx, tile_rows, LANE), lambda b, t: (b, 0, t, 0)),
                pl.BlockSpec(memory_space=pltpu.MemorySpace.SMEM),  # w_g
                pl.BlockSpec(memory_space=pltpu.MemorySpace.SMEM),  # b_g
                pl.BlockSpec(memory_space=pltpu.MemorySpace.SMEM),  # w_x
                pl.BlockSpec(memory_space=pltpu.MemorySpace.SMEM),  # w_a
                pl.BlockSpec(memory_space=pltpu.MemorySpace.SMEM),  # b_a
            ],
            out_specs=pl.BlockSpec((None, Cx, tile_rows, LANE),
                                   lambda b, t: (b, 0, t, 0)),
        ),
        compiler_params=pltpu.CompilerParams(
            dimension_semantics=("parallel", "parallel"),
            vmem_limit_bytes=vmem_limit),
    )(g_r, x_r, wg, bg, wx, wa, ba)

    if Pp != P:
        out = out_r.reshape(B, Cx, Pp)[:, :, :P]
    else:
        out = out_r
    return out.reshape(B, Cx, H, W)


def attention_gate_ref(g, x, params):
    """Pure-JAX reference with identical NCHW semantics."""
    g_c = jnp.einsum("bghw,ig->bihw", g, params["w_g"]) \
        + params["b_g"][None, :, None, None]
    x_c = jnp.einsum("bxhw,ix->bihw", x, params["w_x"])
    combined = jnp.maximum(g_c + x_c, 0.0)
    logits = jnp.einsum("bihw,ai->bahw", combined, params["w_a"]) \
        + params["b_a"][None, :, None, None]
    alpha = jax.nn.sigmoid(logits)
    return alpha * x


def init_params(key, nc_g, nc_x, nc_inner, mask_channel_wise=False):
    """Deterministic Kaiming-style init (conv biases zeroed, as in the module)."""
    k1, k2, k3 = jax.random.split(key, 3)
    n_alpha = nc_x if mask_channel_wise else 1

    def kaiming(k, fan_out, fan_in):
        std = np.sqrt(2.0 / fan_in)
        return std * jax.random.normal(k, (fan_out, fan_in), dtype=jnp.float32)

    return {
        "w_g": kaiming(k1, nc_inner, nc_g),
        "b_g": jnp.zeros((nc_inner,), jnp.float32),
        "w_x": kaiming(k2, nc_inner, nc_x),
        "w_a": kaiming(k3, n_alpha, nc_inner),
        "b_a": jnp.zeros((n_alpha,), jnp.float32),
    }


def _check(g, x, params, rtol=1e-5, atol=1e-5):
    gate = jax.jit(attention_gate)
    ref = attention_gate_ref(g, x, params)
    out = jax.block_until_ready(gate(g, x, params))
    np.testing.assert_allclose(np.asarray(out), np.asarray(ref),
                               rtol=rtol, atol=atol)


if __name__ == "__main__":
    key = jax.random.PRNGKey(0)
    kg, kx, kp, kp2, kg3, kx3, kp3 = jax.random.split(key, 7)

    # 1) Default config (mask_channel_wise=False), small 16x16 image.
    B, nc_g, nc_x, nc_inner, H, W = 2, 4, 4, 8, 16, 16
    g = jax.random.normal(kg, (B, nc_g, H, W), dtype=jnp.float32)
    x = jax.random.normal(kx, (B, nc_x, H, W), dtype=jnp.float32)
    params = init_params(kp, nc_g, nc_x, nc_inner, mask_channel_wise=False)
    _check(g, x, params)

    # 2) Channel-wise mask variant (alpha per x channel), same shapes.
    params_cw = init_params(kp2, nc_g, nc_x, nc_inner, mask_channel_wise=True)
    _check(g, x, params_cw)

    # 3) Larger image (64x64) to exercise the in-kernel pixel-chunk loop,
    #    plus a non-128-multiple pixel count (19x23) to exercise the pad path.
    g3 = jax.random.normal(kg3, (2, nc_g, 64, 64), dtype=jnp.float32)
    x3 = jax.random.normal(kx3, (2, nc_x, 64, 64), dtype=jnp.float32)
    _check(g3, x3, params)

    g4 = jax.random.normal(kg3, (1, nc_g, 19, 23), dtype=jnp.float32)
    x4 = jax.random.normal(kx3, (1, nc_x, 19, 23), dtype=jnp.float32)
    params4 = init_params(kp3, nc_g, nc_x, nc_inner, mask_channel_wise=False)
    _check(g4, x4, params4)

    print("KERNEL_OK")
</pallas_src>

<mosaic_0001>
module attributes {stable_mosaic.version = 11 : i64} {
  func.func @_attention_gate_kernel(%arg0: i32, %arg1: i32, %arg2: memref<1x4x2x128xf32, #tpu.memory_space<vmem>>, %arg3: memref<1x4x2x128xf32, #tpu.memory_space<vmem>>, %arg4: memref<8x4xf32, #tpu.memory_space<smem>>, %arg5: memref<8xf32, #tpu.memory_space<smem>>, %arg6: memref<8x4xf32, #tpu.memory_space<smem>>, %arg7: memref<1x8xf32, #tpu.memory_space<smem>>, %arg8: memref<1xf32, #tpu.memory_space<smem>>, %arg9: memref<1x4x2x128xf32, #tpu.memory_space<vmem>>) attributes {dimension_semantics = [#tpu.dimension_semantics<parallel>, #tpu.dimension_semantics<parallel>], iteration_bounds = array<i64: 2, 1>, scalar_prefetch = 0 : i64, scratch_operands = 0 : i64, tpu.core_type = #tpu.core_type<tc>, window_params = [{transform_indices = @transform_0, window_bounds = array<i64: 1, 4, 2, 128>}, {transform_indices = @transform_1, window_bounds = array<i64: 1, 4, 2, 128>}, {transform_indices = @transform_2, window_bounds = array<i64: 8, 4>}, {transform_indices = @transform_3, window_bounds = array<i64: 8>}, {transform_indices = @transform_4, window_bounds = array<i64: 8, 4>}, {transform_indices = @transform_5, window_bounds = array<i64: 1, 8>}, {transform_indices = @transform_6, window_bounds = array<i64: 1>}, {transform_indices = @transform_7, window_bounds = array<i64: 1, 4, 2, 128>}]} {
    %c0 = arith.constant 0 : index
    %c0_0 = arith.constant 0 : index
    %0 = memref.load %arg4[%c0, %c0_0] : memref<8x4xf32, #tpu.memory_space<smem>>
    %c0_1 = arith.constant 0 : index
    %c1 = arith.constant 1 : index
    %1 = memref.load %arg4[%c0_1, %c1] : memref<8x4xf32, #tpu.memory_space<smem>>
    %c0_2 = arith.constant 0 : index
    %c2 = arith.constant 2 : index
    %2 = memref.load %arg4[%c0_2, %c2] : memref<8x4xf32, #tpu.memory_space<smem>>
    %c0_3 = arith.constant 0 : index
    %c3 = arith.constant 3 : index
    %3 = memref.load %arg4[%c0_3, %c3] : memref<8x4xf32, #tpu.memory_space<smem>>
    %c1_4 = arith.constant 1 : index
    %c0_5 = arith.constant 0 : index
    %4 = memref.load %arg4[%c1_4, %c0_5] : memref<8x4xf32, #tpu.memory_space<smem>>
    %c1_6 = arith.constant 1 : index
    %c1_7 = arith.constant 1 : index
    %5 = memref.load %arg4[%c1_6, %c1_7] : memref<8x4xf32, #tpu.memory_space<smem>>
    %c1_8 = arith.constant 1 : index
    %c2_9 = arith.constant 2 : index
    %6 = memref.load %arg4[%c1_8, %c2_9] : memref<8x4xf32, #tpu.memory_space<smem>>
    %c1_10 = arith.constant 1 : index
    %c3_11 = arith.constant 3 : index
    %7 = memref.load %arg4[%c1_10, %c3_11] : memref<8x4xf32, #tpu.memory_space<smem>>
    %c2_12 = arith.constant 2 : index
    %c0_13 = arith.constant 0 : index
    %8 = memref.load %arg4[%c2_12, %c0_13] : memref<8x4xf32, #tpu.memory_space<smem>>
    %c2_14 = arith.constant 2 : index
    %c1_15 = arith.constant 1 : index
    %9 = memref.load %arg4[%c2_14, %c1_15] : memref<8x4xf32, #tpu.memory_space<smem>>
    %c2_16 = arith.constant 2 : index
    %c2_17 = arith.constant 2 : index
    %10 = memref.load %arg4[%c2_16, %c2_17] : memref<8x4xf32, #tpu.memory_space<smem>>
    %c2_18 = arith.constant 2 : index
    %c3_19 = arith.constant 3 : index
    %11 = memref.load %arg4[%c2_18, %c3_19] : memref<8x4xf32, #tpu.memory_space<smem>>
    %c3_20 = arith.constant 3 : index
    %c0_21 = arith.constant 0 : index
    %12 = memref.load %arg4[%c3_20, %c0_21] : memref<8x4xf32, #tpu.memory_space<smem>>
    %c3_22 = arith.constant 3 : index
    %c1_23 = arith.constant 1 : index
    %13 = memref.load %arg4[%c3_22, %c1_23] : memref<8x4xf32, #tpu.memory_space<smem>>
    %c3_24 = arith.constant 3 : index
    %c2_25 = arith.constant 2 : index
    %14 = memref.load %arg4[%c3_24, %c2_25] : memref<8x4xf32, #tpu.memory_space<smem>>
    %c3_26 = arith.constant 3 : index
    %c3_27 = arith.constant 3 : index
    %15 = memref.load %arg4[%c3_26, %c3_27] : memref<8x4xf32, #tpu.memory_space<smem>>
    %c4 = arith.constant 4 : index
    %c0_28 = arith.constant 0 : index
    %16 = memref.load %arg4[%c4, %c0_28] : memref<8x4xf32, #tpu.memory_space<smem>>
    %c4_29 = arith.constant 4 : index
    %c1_30 = arith.constant 1 : index
    %17 = memref.load %arg4[%c4_29, %c1_30] : memref<8x4xf32, #tpu.memory_space<smem>>
    %c4_31 = arith.constant 4 : index
    %c2_32 = arith.constant 2 : index
    %18 = memref.load %arg4[%c4_31, %c2_32] : memref<8x4xf32, #tpu.memory_space<smem>>
    %c4_33 = arith.constant 4 : index
    %c3_34 = arith.constant 3 : index
    %19 = memref.load %arg4[%c4_33, %c3_34] : memref<8x4xf32, #tpu.memory_space<smem>>
    %c5 = arith.constant 5 : index
    %c0_35 = arith.constant 0 : index
    %20 = memref.load %arg4[%c5, %c0_35] : memref<8x4xf32, #tpu.memory_space<smem>>
    %c5_36 = arith.constant 5 : index
    %c1_37 = arith.constant 1 : index
    %21 = memref.load %arg4[%c5_36, %c1_37] : memref<8x4xf32, #tpu.memory_space<smem>>
    %c5_38 = arith.constant 5 : index
    %c2_39 = arith.constant 2 : index
    %22 = memref.load %arg4[%c5_38, %c2_39] : memref<8x4xf32, #tpu.memory_space<smem>>
    %c5_40 = arith.constant 5 : index
    %c3_41 = arith.constant 3 : index
    %23 = memref.load %arg4[%c5_40, %c3_41] : memref<8x4xf32, #tpu.memory_space<smem>>
    %c6 = arith.constant 6 : index
    %c0_42 = arith.constant 0 : index
    %24 = memref.load %arg4[%c6, %c0_42] : memref<8x4xf32, #tpu.memory_space<smem>>
    %c6_43 = arith.constant 6 : index
    %c1_44 = arith.constant 1 : index
    %25 = memref.load %arg4[%c6_43, %c1_44] : memref<8x4xf32, #tpu.memory_space<smem>>
    %c6_45 = arith.constant 6 : index
    %c2_46 = arith.constant 2 : index
    %26 = memref.load %arg4[%c6_45, %c2_46] : memref<8x4xf32, #tpu.memory_space<smem>>
    %c6_47 = arith.constant 6 : index
    %c3_48 = arith.constant 3 : index
    %27 = memref.load %arg4[%c6_47, %c3_48] : memref<8x4xf32, #tpu.memory_space<smem>>
    %c7 = arith.constant 7 : index
    %c0_49 = arith.constant 0 : index
    %28 = memref.load %arg4[%c7, %c0_49] : memref<8x4xf32, #tpu.memory_space<smem>>
    %c7_50 = arith.constant 7 : index
    %c1_51 = arith.constant 1 : index
    %29 = memref.load %arg4[%c7_50, %c1_51] : memref<8x4xf32, #tpu.memory_space<smem>>
    %c7_52 = arith.constant 7 : index
    %c2_53 = arith.constant 2 : index
    %30 = memref.load %arg4[%c7_52, %c2_53] : memref<8x4xf32, #tpu.memory_space<smem>>
    %c7_54 = arith.constant 7 : index
    %c3_55 = arith.constant 3 : index
    %31 = memref.load %arg4[%c7_54, %c3_55] : memref<8x4xf32, #tpu.memory_space<smem>>
    %c0_56 = arith.constant 0 : index
    %32 = memref.load %arg5[%c0_56] : memref<8xf32, #tpu.memory_space<smem>>
    %c1_57 = arith.constant 1 : index
    %33 = memref.load %arg5[%c1_57] : memref<8xf32, #tpu.memory_space<smem>>
    %c2_58 = arith.constant 2 : index
    %34 = memref.load %arg5[%c2_58] : memref<8xf32, #tpu.memory_space<smem>>
    %c3_59 = arith.constant 3 : index
    %35 = memref.load %arg5[%c3_59] : memref<8xf32, #tpu.memory_space<smem>>
    %c4_60 = arith.constant 4 : index
    %36 = memref.load %arg5[%c4_60] : memref<8xf32, #tpu.memory_space<smem>>
    %c5_61 = arith.constant 5 : index
    %37 = memref.load %arg5[%c5_61] : memref<8xf32, #tpu.memory_space<smem>>
    %c6_62 = arith.constant 6 : index
    %38 = memref.load %arg5[%c6_62] : memref<8xf32, #tpu.memory_space<smem>>
    %c7_63 = arith.constant 7 : index
    %39 = memref.load %arg5[%c7_63] : memref<8xf32, #tpu.memory_space<smem>>
    %c0_64 = arith.constant 0 : index
    %c0_65 = arith.constant 0 : index
    %40 = memref.load %arg6[%c0_64, %c0_65] : memref<8x4xf32, #tpu.memory_space<smem>>
    %c0_66 = arith.constant 0 : index
    %c1_67 = arith.constant 1 : index
    %41 = memref.load %arg6[%c0_66, %c1_67] : memref<8x4xf32, #tpu.memory_space<smem>>
    %c0_68 = arith.constant 0 : index
    %c2_69 = arith.constant 2 : index
    %42 = memref.load %arg6[%c0_68, %c2_69] : memref<8x4xf32, #tpu.memory_space<smem>>
    %c0_70 = arith.constant 0 : index
    %c3_71 = arith.constant 3 : index
    %43 = memref.load %arg6[%c0_70, %c3_71] : memref<8x4xf32, #tpu.memory_space<smem>>
    %c1_72 = arith.constant 1 : index
    %c0_73 = arith.constant 0 : index
    %44 = memref.load %arg6[%c1_72, %c0_73] : memref<8x4xf32, #tpu.memory_space<smem>>
    %c1_74 = arith.constant 1 : index
    %c1_75 = arith.constant 1 : index
    %45 = memref.load %arg6[%c1_74, %c1_75] : memref<8x4xf32, #tpu.memory_space<smem>>
    %c1_76 = arith.constant 1 : index
    %c2_77 = arith.constant 2 : index
    %46 = memref.load %arg6[%c1_76, %c2_77] : memref<8x4xf32, #tpu.memory_space<smem>>
    %c1_78 = arith.constant 1 : index
    %c3_79 = arith.constant 3 : index
    %47 = memref.load %arg6[%c1_78, %c3_79] : memref<8x4xf32, #tpu.memory_space<smem>>
    %c2_80 = arith.constant 2 : index
    %c0_81 = arith.constant 0 : index
    %48 = memref.load %arg6[%c2_80, %c0_81] : memref<8x4xf32, #tpu.memory_space<smem>>
    %c2_82 = arith.constant 2 : index
    %c1_83 = arith.constant 1 : index
    %49 = memref.load %arg6[%c2_82, %c1_83] : memref<8x4xf32, #tpu.memory_space<smem>>
    %c2_84 = arith.constant 2 : index
    %c2_85 = arith.constant 2 : index
    %50 = memref.load %arg6[%c2_84, %c2_85] : memref<8x4xf32, #tpu.memory_space<smem>>
    %c2_86 = arith.constant 2 : index
    %c3_87 = arith.constant 3 : index
    %51 = memref.load %arg6[%c2_86, %c3_87] : memref<8x4xf32, #tpu.memory_space<smem>>
    %c3_88 = arith.constant 3 : index
    %c0_89 = arith.constant 0 : index
    %52 = memref.load %arg6[%c3_88, %c0_89] : memref<8x4xf32, #tpu.memory_space<smem>>
    %c3_90 = arith.constant 3 : index
    %c1_91 = arith.constant 1 : index
    %53 = memref.load %arg6[%c3_90, %c1_91] : memref<8x4xf32, #tpu.memory_space<smem>>
    %c3_92 = arith.constant 3 : index
    %c2_93 = arith.constant 2 : index
    %54 = memref.load %arg6[%c3_92, %c2_93] : memref<8x4xf32, #tpu.memory_space<smem>>
    %c3_94 = arith.constant 3 : index
    %c3_95 = arith.constant 3 : index
    %55 = memref.load %arg6[%c3_94, %c3_95] : memref<8x4xf32, #tpu.memory_space<smem>>
    %c4_96 = arith.constant 4 : index
    %c0_97 = arith.constant 0 : index
    %56 = memref.load %arg6[%c4_96, %c0_97] : memref<8x4xf32, #tpu.memory_space<smem>>
    %c4_98 = arith.constant 4 : index
    %c1_99 = arith.constant 1 : index
    %57 = memref.load %arg6[%c4_98, %c1_99] : memref<8x4xf32, #tpu.memory_space<smem>>
    %c4_100 = arith.constant 4 : index
    %c2_101 = arith.constant 2 : index
    %58 = memref.load %arg6[%c4_100, %c2_101] : memref<8x4xf32, #tpu.memory_space<smem>>
    %c4_102 = arith.constant 4 : index
    %c3_103 = arith.constant 3 : index
    %59 = memref.load %arg6[%c4_102, %c3_103] : memref<8x4xf32, #tpu.memory_space<smem>>
    %c5_104 = arith.constant 5 : index
    %c0_105 = arith.constant 0 : index
    %60 = memref.load %arg6[%c5_104, %c0_105] : memref<8x4xf32, #tpu.memory_space<smem>>
    %c5_106 = arith.constant 5 : index
    %c1_107 = arith.constant 1 : index
    %61 = memref.load %arg6[%c5_106, %c1_107] : memref<8x4xf32, #tpu.memory_space<smem>>
    %c5_108 = arith.constant 5 : index
    %c2_109 = arith.constant 2 : index
    %62 = memref.load %arg6[%c5_108, %c2_109] : memref<8x4xf32, #tpu.memory_space<smem>>
    %c5_110 = arith.constant 5 : index
    %c3_111 = arith.constant 3 : index
    %63 = memref.load %arg6[%c5_110, %c3_111] : memref<8x4xf32, #tpu.memory_space<smem>>
    %c6_112 = arith.constant 6 : index
    %c0_113 = arith.constant 0 : index
    %64 = memref.load %arg6[%c6_112, %c0_113] : memref<8x4xf32, #tpu.memory_space<smem>>
    %c6_114 = arith.constant 6 : index
    %c1_115 = arith.constant 1 : index
    %65 = memref.load %arg6[%c6_114, %c1_115] : memref<8x4xf32, #tpu.memory_space<smem>>
    %c6_116 = arith.constant 6 : index
    %c2_117 = arith.constant 2 : index
    %66 = memref.load %arg6[%c6_116, %c2_117] : memref<8x4xf32, #tpu.memory_space<smem>>
    %c6_118 = arith.constant 6 : index
    %c3_119 = arith.constant 3 : index
    %67 = memref.load %arg6[%c6_118, %c3_119] : memref<8x4xf32, #tpu.memory_space<smem>>
    %c7_120 = arith.constant 7 : index
    %c0_121 = arith.constant 0 : index
    %68 = memref.load %arg6[%c7_120, %c0_121] : memref<8x4xf32, #tpu.memory_space<smem>>
    %c7_122 = arith.constant 7 : index
    %c1_123 = arith.constant 1 : index
    %69 = memref.load %arg6[%c7_122, %c1_123] : memref<8x4xf32, #tpu.memory_space<smem>>
    %c7_124 = arith.constant 7 : index
    %c2_125 = arith.constant 2 : index
    %70 = memref.load %arg6[%c7_124, %c2_125] : memref<8x4xf32, #tpu.memory_space<smem>>
    %c7_126 = arith.constant 7 : index
    %c3_127 = arith.constant 3 : index
    %71 = memref.load %arg6[%c7_126, %c3_127] : memref<8x4xf32, #tpu.memory_space<smem>>
    %c0_128 = arith.constant 0 : index
    %c0_129 = arith.constant 0 : index
    %72 = memref.load %arg7[%c0_128, %c0_129] : memref<1x8xf32, #tpu.memory_space<smem>>
    %c0_130 = arith.constant 0 : index
    %c1_131 = arith.constant 1 : index
    %73 = memref.load %arg7[%c0_130, %c1_131] : memref<1x8xf32, #tpu.memory_space<smem>>
    %c0_132 = arith.constant 0 : index
    %c2_133 = arith.constant 2 : index
    %74 = memref.load %arg7[%c0_132, %c2_133] : memref<1x8xf32, #tpu.memory_space<smem>>
    %c0_134 = arith.constant 0 : index
    %c3_135 = arith.constant 3 : index
    %75 = memref.load %arg7[%c0_134, %c3_135] : memref<1x8xf32, #tpu.memory_space<smem>>
    %c0_136 = arith.constant 0 : index
    %c4_137 = arith.constant 4 : index
    %76 = memref.load %arg7[%c0_136, %c4_137] : memref<1x8xf32, #tpu.memory_space<smem>>
    %c0_138 = arith.constant 0 : index
    %c5_139 = arith.constant 5 : index
    %77 = memref.load %arg7[%c0_138, %c5_139] : memref<1x8xf32, #tpu.memory_space<smem>>
    %c0_140 = arith.constant 0 : index
    %c6_141 = arith.constant 6 : index
    %78 = memref.load %arg7[%c0_140, %c6_141] : memref<1x8xf32, #tpu.memory_space<smem>>
    %c0_142 = arith.constant 0 : index
    %c7_143 = arith.constant 7 : index
    %79 = memref.load %arg7[%c0_142, %c7_143] : memref<1x8xf32, #tpu.memory_space<smem>>
    %c0_144 = arith.constant 0 : index
    %80 = memref.load %arg8[%c0_144] : memref<1xf32, #tpu.memory_space<smem>>
    %c0_145 = arith.constant 0 : index
    %c0_146 = arith.constant 0 : index
    %c0_147 = arith.constant 0 : index
    %c0_148 = arith.constant 0 : index
    %81 = vector.load %arg2[%c0_145, %c0_146, %c0_147, %c0_148] : memref<1x4x2x128xf32, #tpu.memory_space<vmem>>, vector<1x4x2x128xf32>
    %82 = vector.shape_cast %81 : vector<1x4x2x128xf32> to vector<4x2x128xf32>
    %c0_149 = arith.constant 0 : index
    %c0_150 = arith.constant 0 : index
    %c0_151 = arith.constant 0 : index
    %c0_152 = arith.constant 0 : index
    %83 = vector.load %arg3[%c0_149, %c0_150, %c0_151, %c0_152] : memref<1x4x2x128xf32, #tpu.memory_space<vmem>>, vector<1x4x2x128xf32>
    %84 = vector.shape_cast %83 : vector<1x4x2x128xf32> to vector<4x2x128xf32>
    %85 = vector.extract_strided_slice %82 {offsets = [0, 0, 0], sizes = [1, 2, 128], strides = [1, 1, 1]} : vector<4x2x128xf32> to vector<1x2x128xf32>
    %86 = vector.shape_cast %85 : vector<1x2x128xf32> to vector<2x128xf32>
    %87 = vector.broadcast %0 : f32 to vector<2x128xf32>
    %88 = arith.mulf %87, %86 : vector<2x128xf32>
    %89 = vector.broadcast %32 : f32 to vector<2x128xf32>
    %90 = arith.addf %89, %88 : vector<2x128xf32>
    %91 = vector.extract_strided_slice %82 {offsets = [1, 0, 0], sizes = [1, 2, 128], strides = [1, 1, 1]} : vector<4x2x128xf32> to vector<1x2x128xf32>
    %92 = vector.shape_cast %91 : vector<1x2x128xf32> to vector<2x128xf32>
    %93 = vector.broadcast %1 : f32 to vector<2x128xf32>
    %94 = arith.mulf %93, %92 : vector<2x128xf32>
    %95 = arith.addf %90, %94 : vector<2x128xf32>
    %96 = vector.extract_strided_slice %82 {offsets = [2, 0, 0], sizes = [1, 2, 128], strides = [1, 1, 1]} : vector<4x2x128xf32> to vector<1x2x128xf32>
    %97 = vector.shape_cast %96 : vector<1x2x128xf32> to vector<2x128xf32>
    %98 = vector.broadcast %2 : f32 to vector<2x128xf32>
    %99 = arith.mulf %98, %97 : vector<2x128xf32>
    %100 = arith.addf %95, %99 : vector<2x128xf32>
    %101 = vector.extract_strided_slice %82 {offsets = [3, 0, 0], sizes = [1, 2, 128], strides = [1, 1, 1]} : vector<4x2x128xf32> to vector<1x2x128xf32>
    %102 = vector.shape_cast %101 : vector<1x2x128xf32> to vector<2x128xf32>
    %103 = vector.broadcast %3 : f32 to vector<2x128xf32>
    %104 = arith.mulf %103, %102 : vector<2x128xf32>
    %105 = arith.addf %100, %104 : vector<2x128xf32>
    %106 = vector.extract_strided_slice %84 {offsets = [0, 0, 0], sizes = [1, 2, 128], strides = [1, 1, 1]} : vector<4x2x128xf32> to vector<1x2x128xf32>
    %107 = vector.shape_cast %106 : vector<1x2x128xf32> to vector<2x128xf32>
    %108 = vector.broadcast %40 : f32 to vector<2x128xf32>
    %109 = arith.mulf %108, %107 : vector<2x128xf32>
    %110 = arith.addf %105, %109 : vector<2x128xf32>
    %111 = vector.extract_strided_slice %84 {offsets = [1, 0, 0], sizes = [1, 2, 128], strides = [1, 1, 1]} : vector<4x2x128xf32> to vector<1x2x128xf32>
    %112 = vector.shape_cast %111 : vector<1x2x128xf32> to vector<2x128xf32>
    %113 = vector.broadcast %41 : f32 to vector<2x128xf32>
    %114 = arith.mulf %113, %112 : vector<2x128xf32>
    %115 = arith.addf %110, %114 : vector<2x128xf32>
    %116 = vector.extract_strided_slice %84 {offsets = [2, 0, 0], sizes = [1, 2, 128], strides = [1, 1, 1]} : vector<4x2x128xf32> to vector<1x2x128xf32>
    %117 = vector.shape_cast %116 : vector<1x2x128xf32> to vector<2x128xf32>
    %118 = vector.broadcast %42 : f32 to vector<2x128xf32>
    %119 = arith.mulf %118, %117 : vector<2x128xf32>
    %120 = arith.addf %115, %119 : vector<2x128xf32>
    %121 = vector.extract_strided_slice %84 {offsets = [3, 0, 0], sizes = [1, 2, 128], strides = [1, 1, 1]} : vector<4x2x128xf32> to vector<1x2x128xf32>
    %122 = vector.shape_cast %121 : vector<1x2x128xf32> to vector<2x128xf32>
    %123 = vector.broadcast %43 : f32 to vector<2x128xf32>
    %124 = arith.mulf %123, %122 : vector<2x128xf32>
    %125 = arith.addf %120, %124 : vector<2x128xf32>
    %cst = arith.constant 0.000000e+00 : f32
    %126 = vector.broadcast %cst : f32 to vector<2x128xf32>
    %127 = arith.maximumf %125, %126 : vector<2x128xf32>
    %128 = vector.broadcast %72 : f32 to vector<2x128xf32>
    %129 = arith.mulf %128, %127 : vector<2x128xf32>
    %130 = vector.extract_strided_slice %82 {offsets = [0, 0, 0], sizes = [1, 2, 128], strides = [1, 1, 1]} : vector<4x2x128xf32> to vector<1x2x128xf32>
    %131 = vector.shape_cast %130 : vector<1x2x128xf32> to vector<2x128xf32>
    %132 = vector.broadcast %4 : f32 to vector<2x128xf32>
    %133 = arith.mulf %132, %131 : vector<2x128xf32>
    %134 = vector.broadcast %33 : f32 to vector<2x128xf32>
    %135 = arith.addf %134, %133 : vector<2x128xf32>
    %136 = vector.extract_strided_slice %82 {offsets = [1, 0, 0], sizes = [1, 2, 128], strides = [1, 1, 1]} : vector<4x2x128xf32> to vector<1x2x128xf32>
    %137 = vector.shape_cast %136 : vector<1x2x128xf32> to vector<2x128xf32>
    %138 = vector.broadcast %5 : f32 to vector<2x128xf32>
    %139 = arith.mulf %138, %137 : vector<2x128xf32>
    %140 = arith.addf %135, %139 : vector<2x128xf32>
    %141 = vector.extract_strided_slice %82 {offsets = [2, 0, 0], sizes = [1, 2, 128], strides = [1, 1, 1]} : vector<4x2x128xf32> to vector<1x2x128xf32>
    %142 = vector.shape_cast %141 : vector<1x2x128xf32> to vector<2x128xf32>
    %143 = vector.broadcast %6 : f32 to vector<2x128xf32>
    %144 = arith.mulf %143, %142 : vector<2x128xf32>
    %145 = arith.addf %140, %144 : vector<2x128xf32>
    %146 = vector.extract_strided_slice %82 {offsets = [3, 0, 0], sizes = [1, 2, 128], strides = [1, 1, 1]} : vector<4x2x128xf32> to vector<1x2x128xf32>
    %147 = vector.shape_cast %146 : vector<1x2x128xf32> to vector<2x128xf32>
    %148 = vector.broadcast %7 : f32 to vector<2x128xf32>
    %149 = arith.mulf %148, %147 : vector<2x128xf32>
    %150 = arith.addf %145, %149 : vector<2x128xf32>
    %151 = vector.extract_strided_slice %84 {offsets = [0, 0, 0], sizes = [1, 2, 128], strides = [1, 1, 1]} : vector<4x2x128xf32> to vector<1x2x128xf32>
    %152 = vector.shape_cast %151 : vector<1x2x128xf32> to vector<2x128xf32>
    %153 = vector.broadcast %44 : f32 to vector<2x128xf32>
    %154 = arith.mulf %153, %152 : vector<2x128xf32>
    %155 = arith.addf %150, %154 : vector<2x128xf32>
    %156 = vector.extract_strided_slice %84 {offsets = [1, 0, 0], sizes = [1, 2, 128], strides = [1, 1, 1]} : vector<4x2x128xf32> to vector<1x2x128xf32>
    %157 = vector.shape_cast %156 : vector<1x2x128xf32> to vector<2x128xf32>
    %158 = vector.broadcast %45 : f32 to vector<2x128xf32>
    %159 = arith.mulf %158, %157 : vector<2x128xf32>
    %160 = arith.addf %155, %159 : vector<2x128xf32>
    %161 = vector.extract_strided_slice %84 {offsets = [2, 0, 0], sizes = [1, 2, 128], strides = [1, 1, 1]} : vector<4x2x128xf32> to vector<1x2x128xf32>
    %162 = vector.shape_cast %161 : vector<1x2x128xf32> to vector<2x128xf32>
    %163 = vector.broadcast %46 : f32 to vector<2x128xf32>
    %164 = arith.mulf %163, %162 : vector<2x128xf32>
    %165 = arith.addf %160, %164 : vector<2x128xf32>
    %166 = vector.extract_strided_slice %84 {offsets = [3, 0, 0], sizes = [1, 2, 128], strides = [1, 1, 1]} : vector<4x2x128xf32> to vector<1x2x128xf32>
    %167 = vector.shape_cast %166 : vector<1x2x128xf32> to vector<2x128xf32>
    %168 = vector.broadcast %47 : f32 to vector<2x128xf32>
    %169 = arith.mulf %168, %167 : vector<2x128xf32>
    %170 = arith.addf %165, %169 : vector<2x128xf32>
    %cst_153 = arith.constant 0.000000e+00 : f32
    %171 = vector.broadcast %cst_153 : f32 to vector<2x128xf32>
    %172 = arith.maximumf %170, %171 : vector<2x128xf32>
    %173 = vector.broadcast %73 : f32 to vector<2x128xf32>
    %174 = arith.mulf %173, %172 : vector<2x128xf32>
    %175 = arith.addf %129, %174 : vector<2x128xf32>
    %176 = vector.extract_strided_slice %82 {offsets = [0, 0, 0], sizes = [1, 2, 128], strides = [1, 1, 1]} : vector<4x2x128xf32> to vector<1x2x128xf32>
    %177 = vector.shape_cast %176 : vector<1x2x128xf32> to vector<2x128xf32>
    %178 = vector.broadcast %8 : f32 to vector<2x128xf32>
    %179 = arith.mulf %178, %177 : vector<2x128xf32>
    %180 = vector.broadcast %34 : f32 to vector<2x128xf32>
    %181 = arith.addf %180, %179 : vector<2x128xf32>
    %182 = vector.extract_strided_slice %82 {offsets = [1, 0, 0], sizes = [1, 2, 128], strides = [1, 1, 1]} : vector<4x2x128xf32> to vector<1x2x128xf32>
    %183 = vector.shape_cast %182 : vector<1x2x128xf32> to vector<2x128xf32>
    %184 = vector.broadcast %9 : f32 to vector<2x128xf32>
    %185 = arith.mulf %184, %183 : vector<2x128xf32>
    %186 = arith.addf %181, %185 : vector<2x128xf32>
    %187 = vector.extract_strided_slice %82 {offsets = [2, 0, 0], sizes = [1, 2, 128], strides = [1, 1, 1]} : vector<4x2x128xf32> to vector<1x2x128xf32>
    %188 = vector.shape_cast %187 : vector<1x2x128xf32> to vector<2x128xf32>
    %189 = vector.broadcast %10 : f32 to vector<2x128xf32>
    %190 = arith.mulf %189, %188 : vector<2x128xf32>
    %191 = arith.addf %186, %190 : vector<2x128xf32>
    %192 = vector.extract_strided_slice %82 {offsets = [3, 0, 0], sizes = [1, 2, 128], strides = [1, 1, 1]} : vector<4x2x128xf32> to vector<1x2x128xf32>
    %193 = vector.shape_cast %192 : vector<1x2x128xf32> to vector<2x128xf32>
    %194 = vector.broadcast %11 : f32 to vector<2x128xf32>
    %195 = arith.mulf %194, %193 : vector<2x128xf32>
    %196 = arith.addf %191, %195 : vector<2x128xf32>
    %197 = vector.extract_strided_slice %84 {offsets = [0, 0, 0], sizes = [1, 2, 128], strides = [1, 1, 1]} : vector<4x2x128xf32> to vector<1x2x128xf32>
    %198 = vector.shape_cast %197 : vector<1x2x128xf32> to vector<2x128xf32>
    %199 = vector.broadcast %48 : f32 to vector<2x128xf32>
    %200 = arith.mulf %199, %198 : vector<2x128xf32>
    %201 = arith.addf %196, %200 : vector<2x128xf32>
    %202 = vector.extract_strided_slice %84 {offsets = [1, 0, 0], sizes = [1, 2, 128], strides = [1, 1, 1]} : vector<4x2x128xf32> to vector<1x2x128xf32>
    %203 = vector.shape_cast %202 : vector<1x2x128xf32> to vector<2x128xf32>
    %204 = vector.broadcast %49 : f32 to vector<2x128xf32>
    %205 = arith.mulf %204, %203 : vector<2x128xf32>
    %206 = arith.addf %201, %205 : vector<2x128xf32>
    %207 = vector.extract_strided_slice %84 {offsets = [2, 0, 0], sizes = [1, 2, 128], strides = [1, 1, 1]} : vector<4x2x128xf32> to vector<1x2x128xf32>
    %208 = vector.shape_cast %207 : vector<1x2x128xf32> to vector<2x128xf32>
    %209 = vector.broadcast %50 : f32 to vector<2x128xf32>
    %210 = arith.mulf %209, %208 : vector<2x128xf32>
    %211 = arith.addf %206, %210 : vector<2x128xf32>
    %212 = vector.extract_strided_slice %84 {offsets = [3, 0, 0], sizes = [1, 2, 128], strides = [1, 1, 1]} : vector<4x2x128xf32> to vector<1x2x128xf32>
    %213 = vector.shape_cast %212 : vector<1x2x128xf32> to vector<2x128xf32>
    %214 = vector.broadcast %51 : f32 to vector<2x128xf32>
    %215 = arith.mulf %214, %213 : vector<2x128xf32>
    %216 = arith.addf %211, %215 : vector<2x128xf32>
    %cst_154 = arith.constant 0.000000e+00 : f32
    %217 = vector.broadcast %cst_154 : f32 to vector<2x128xf32>
    %218 = arith.maximumf %216, %217 : vector<2x128xf32>
    %219 = vector.broadcast %74 : f32 to vector<2x128xf32>
    %220 = arith.mulf %219, %218 : vector<2x128xf32>
    %221 = arith.addf %175, %220 : vector<2x128xf32>
    %222 = vector.extract_strided_slice %82 {offsets = [0, 0, 0], sizes = [1, 2, 128], strides = [1, 1, 1]} : vector<4x2x128xf32> to vector<1x2x128xf32>
    %223 = vector.shape_cast %222 : vector<1x2x128xf32> to vector<2x128xf32>
    %224 = vector.broadcast %12 : f32 to vector<2x128xf32>
    %225 = arith.mulf %224, %223 : vector<2x128xf32>
    %226 = vector.broadcast %35 : f32 to vector<2x128xf32>
    %227 = arith.addf %226, %225 : vector<2x128xf32>
    %228 = vector.extract_strided_slice %82 {offsets = [1, 0, 0], sizes = [1, 2, 128], strides = [1, 1, 1]} : vector<4x2x128xf32> to vector<1x2x128xf32>
    %229 = vector.shape_cast %228 : vector<1x2x128xf32> to vector<2x128xf32>
    %230 = vector.broadcast %13 : f32 to vector<2x128xf32>
    %231 = arith.mulf %230, %229 : vector<2x128xf32>
    %232 = arith.addf %227, %231 : vector<2x128xf32>
    %233 = vector.extract_strided_slice %82 {offsets = [2, 0, 0], sizes = [1, 2, 128], strides = [1, 1, 1]} : vector<4x2x128xf32> to vector<1x2x128xf32>
    %234 = vector.shape_cast %233 : vector<1x2x128xf32> to vector<2x128xf32>
    %235 = vector.broadcast %14 : f32 to vector<2x128xf32>
    %236 = arith.mulf %235, %234 : vector<2x128xf32>
    %237 = arith.addf %232, %236 : vector<2x128xf32>
    %238 = vector.extract_strided_slice %82 {offsets = [3, 0, 0], sizes = [1, 2, 128], strides = [1, 1, 1]} : vector<4x2x128xf32> to vector<1x2x128xf32>
    %239 = vector.shape_cast %238 : vector<1x2x128xf32> to vector<2x128xf32>
    %240 = vector.broadcast %15 : f32 to vector<2x128xf32>
    %241 = arith.mulf %240, %239 : vector<2x128xf32>
    %242 = arith.addf %237, %241 : vector<2x128xf32>
    %243 = vector.extract_strided_slice %84 {offsets = [0, 0, 0], sizes = [1, 2, 128], strides = [1, 1, 1]} : vector<4x2x128xf32> to vector<1x2x128xf32>
    %244 = vector.shape_cast %243 : vector<1x2x128xf32> to vector<2x128xf32>
    %245 = vector.broadcast %52 : f32 to vector<2x128xf32>
    %246 = arith.mulf %245, %244 : vector<2x128xf32>
    %247 = arith.addf %242, %246 : vector<2x128xf32>
    %248 = vector.extract_strided_slice %84 {offsets = [1, 0, 0], sizes = [1, 2, 128], strides = [1, 1, 1]} : vector<4x2x128xf32> to vector<1x2x128xf32>
    %249 = vector.shape_cast %248 : vector<1x2x128xf32> to vector<2x128xf32>
    %250 = vector.broadcast %53 : f32 to vector<2x128xf32>
    %251 = arith.mulf %250, %249 : vector<2x128xf32>
    %252 = arith.addf %247, %251 : vector<2x128xf32>
    %253 = vector.extract_strided_slice %84 {offsets = [2, 0, 0], sizes = [1, 2, 128], strides = [1, 1, 1]} : vector<4x2x128xf32> to vector<1x2x128xf32>
    %254 = vector.shape_cast %253 : vector<1x2x128xf32> to vector<2x128xf32>
    %255 = vector.broadcast %54 : f32 to vector<2x128xf32>
    %256 = arith.mulf %255, %254 : vector<2x128xf32>
    %257 = arith.addf %252, %256 : vector<2x128xf32>
    %258 = vector.extract_strided_slice %84 {offsets = [3, 0, 0], sizes = [1, 2, 128], strides = [1, 1, 1]} : vector<4x2x128xf32> to vector<1x2x128xf32>
    %259 = vector.shape_cast %258 : vector<1x2x128xf32> to vector<2x128xf32>
    %260 = vector.broadcast %55 : f32 to vector<2x128xf32>
    %261 = arith.mulf %260, %259 : vector<2x128xf32>
    %262 = arith.addf %257, %261 : vector<2x128xf32>
    %cst_155 = arith.constant 0.000000e+00 : f32
    %263 = vector.broadcast %cst_155 : f32 to vector<2x128xf32>
    %264 = arith.maximumf %262, %263 : vector<2x128xf32>
    %265 = vector.broadcast %75 : f32 to vector<2x128xf32>
    %266 = arith.mulf %265, %264 : vector<2x128xf32>
    %267 = arith.addf %221, %266 : vector<2x128xf32>
    %268 = vector.extract_strided_slice %82 {offsets = [0, 0, 0], sizes = [1, 2, 128], strides = [1, 1, 1]} : vector<4x2x128xf32> to vector<1x2x128xf32>
    %269 = vector.shape_cast %268 : vector<1x2x128xf32> to vector<2x128xf32>
    %270 = vector.broadcast %16 : f32 to vector<2x128xf32>
    %271 = arith.mulf %270, %269 : vector<2x128xf32>
    %272 = vector.broadcast %36 : f32 to vector<2x128xf32>
    %273 = arith.addf %272, %271 : vector<2x128xf32>
    %274 = vector.extract_strided_slice %82 {offsets = [1, 0, 0], sizes = [1, 2, 128], strides = [1, 1, 1]} : vector<4x2x128xf32> to vector<1x2x128xf32>
    %275 = vector.shape_cast %274 : vector<1x2x128xf32> to vector<2x128xf32>
    %276 = vector.broadcast %17 : f32 to vector<2x128xf32>
    %277 = arith.mulf %276, %275 : vector<2x128xf32>
    %278 = arith.addf %273, %277 : vector<2x128xf32>
    %279 = vector.extract_strided_slice %82 {offsets = [2, 0, 0], sizes = [1, 2, 128], strides = [1, 1, 1]} : vector<4x2x128xf32> to vector<1x2x128xf32>
    %280 = vector.shape_cast %279 : vector<1x2x128xf32> to vector<2x128xf32>
    %281 = vector.broadcast %18 : f32 to vector<2x128xf32>
    %282 = arith.mulf %281, %280 : vector<2x128xf32>
    %283 = arith.addf %278, %282 : vector<2x128xf32>
    %284 = vector.extract_strided_slice %82 {offsets = [3, 0, 0], sizes = [1, 2, 128], strides = [1, 1, 1]} : vector<4x2x128xf32> to vector<1x2x128xf32>
    %285 = vector.shape_cast %284 : vector<1x2x128xf32> to vector<2x128xf32>
    %286 = vector.broadcast %19 : f32 to vector<2x128xf32>
    %287 = arith.mulf %286, %285 : vector<2x128xf32>
    %288 = arith.addf %283, %287 : vector<2x128xf32>
    %289 = vector.extract_strided_slice %84 {offsets = [0, 0, 0], sizes = [1, 2, 128], strides = [1, 1, 1]} : vector<4x2x128xf32> to vector<1x2x128xf32>
    %290 = vector.shape_cast %289 : vector<1x2x128xf32> to vector<2x128xf32>
    %291 = vector.broadcast %56 : f32 to vector<2x128xf32>
    %292 = arith.mulf %291, %290 : vector<2x128xf32>
    %293 = arith.addf %288, %292 : vector<2x128xf32>
    %294 = vector.extract_strided_slice %84 {offsets = [1, 0, 0], sizes = [1, 2, 128], strides = [1, 1, 1]} : vector<4x2x128xf32> to vector<1x2x128xf32>
    %295 = vector.shape_cast %294 : vector<1x2x128xf32> to vector<2x128xf32>
    %296 = vector.broadcast %57 : f32 to vector<2x128xf32>
    %297 = arith.mulf %296, %295 : vector<2x128xf32>
    %298 = arith.addf %293, %297 : vector<2x128xf32>
    %299 = vector.extract_strided_slice %84 {offsets = [2, 0, 0], sizes = [1, 2, 128], strides = [1, 1, 1]} : vector<4x2x128xf32> to vector<1x2x128xf32>
    %300 = vector.shape_cast %299 : vector<1x2x128xf32> to vector<2x128xf32>
    %301 = vector.broadcast %58 : f32 to vector<2x128xf32>
    %302 = arith.mulf %301, %300 : vector<2x128xf32>
    %303 = arith.addf %298, %302 : vector<2x128xf32>
    %304 = vector.extract_strided_slice %84 {offsets = [3, 0, 0], sizes = [1, 2, 128], strides = [1, 1, 1]} : vector<4x2x128xf32> to vector<1x2x128xf32>
    %305 = vector.shape_cast %304 : vector<1x2x128xf32> to vector<2x128xf32>
    %306 = vector.broadcast %59 : f32 to vector<2x128xf32>
    %307 = arith.mulf %306, %305 : vector<2x128xf32>
    %308 = arith.addf %303, %307 : vector<2x128xf32>
    %cst_156 = arith.constant 0.000000e+00 : f32
    %309 = vector.broadcast %cst_156 : f32 to vector<2x128xf32>
    %310 = arith.maximumf %308, %309 : vector<2x128xf32>
    %311 = vector.broadcast %76 : f32 to vector<2x128xf32>
    %312 = arith.mulf %311, %310 : vector<2x128xf32>
    %313 = arith.addf %267, %312 : vector<2x128xf32>
    %314 = vector.extract_strided_slice %82 {offsets = [0, 0, 0], sizes = [1, 2, 128], strides = [1, 1, 1]} : vector<4x2x128xf32> to vector<1x2x128xf32>
    %315 = vector.shape_cast %314 : vector<1x2x128xf32> to vector<2x128xf32>
    %316 = vector.broadcast %20 : f32 to vector<2x128xf32>
    %317 = arith.mulf %316, %315 : vector<2x128xf32>
    %318 = vector.broadcast %37 : f32 to vector<2x128xf32>
    %319 = arith.addf %318, %317 : vector<2x128xf32>
    %320 = vector.extract_strided_slice %82 {offsets = [1, 0, 0], sizes = [1, 2, 128], strides = [1, 1, 1]} : vector<4x2x128xf32> to vector<1x2x128xf32>
    %321 = vector.shape_cast %320 : vector<1x2x128xf32> to vector<2x128xf32>
    %322 = vector.broadcast %21 : f32 to vector<2x128xf32>
    %323 = arith.mulf %322, %321 : vector<2x128xf32>
    %324 = arith.addf %319, %323 : vector<2x128xf32>
    %325 = vector.extract_strided_slice %82 {offsets = [2, 0, 0], sizes = [1, 2, 128], strides = [1, 1, 1]} : vector<4x2x128xf32> to vector<1x2x128xf32>
    %326 = vector.shape_cast %325 : vector<1x2x128xf32> to vector<2x128xf32>
    %327 = vector.broadcast %22 : f32 to vector<2x128xf32>
    %328 = arith.mulf %327, %326 : vector<2x128xf32>
    %329 = arith.addf %324, %328 : vector<2x128xf32>
    %330 = vector.extract_strided_slice %82 {offsets = [3, 0, 0], sizes = [1, 2, 128], strides = [1, 1, 1]} : vector<4x2x128xf32> to vector<1x2x128xf32>
    %331 = vector.shape_cast %330 : vector<1x2x128xf32> to vector<2x128xf32>
    %332 = vector.broadcast %23 : f32 to vector<2x128xf32>
    %333 = arith.mulf %332, %331 : vector<2x128xf32>
    %334 = arith.addf %329, %333 : vector<2x128xf32>
    %335 = vector.extract_strided_slice %84 {offsets = [0, 0, 0], sizes = [1, 2, 128], strides = [1, 1, 1]} : vector<4x2x128xf32> to vector<1x2x128xf32>
    %336 = vector.shape_cast %335 : vector<1x2x128xf32> to vector<2x128xf32>
    %337 = vector.broadcast %60 : f32 to vector<2x128xf32>
    %338 = arith.mulf %337, %336 : vector<2x128xf32>
    %339 = arith.addf %334, %338 : vector<2x128xf32>
    %340 = vector.extract_strided_slice %84 {offsets = [1, 0, 0], sizes = [1, 2, 128], strides = [1, 1, 1]} : vector<4x2x128xf32> to vector<1x2x128xf32>
    %341 = vector.shape_cast %340 : vector<1x2x128xf32> to vector<2x128xf32>
    %342 = vector.broadcast %61 : f32 to vector<2x128xf32>
    %343 = arith.mulf %342, %341 : vector<2x128xf32>
    %344 = arith.addf %339, %343 : vector<2x128xf32>
    %345 = vector.extract_strided_slice %84 {offsets = [2, 0, 0], sizes = [1, 2, 128], strides = [1, 1, 1]} : vector<4x2x128xf32> to vector<1x2x128xf32>
    %346 = vector.shape_cast %345 : vector<1x2x128xf32> to vector<2x128xf32>
    %347 = vector.broadcast %62 : f32 to vector<2x128xf32>
    %348 = arith.mulf %347, %346 : vector<2x128xf32>
    %349 = arith.addf %344, %348 : vector<2x128xf32>
    %350 = vector.extract_strided_slice %84 {offsets = [3, 0, 0], sizes = [1, 2, 128], strides = [1, 1, 1]} : vector<4x2x128xf32> to vector<1x2x128xf32>
    %351 = vector.shape_cast %350 : vector<1x2x128xf32> to vector<2x128xf32>
    %352 = vector.broadcast %63 : f32 to vector<2x128xf32>
    %353 = arith.mulf %352, %351 : vector<2x128xf32>
    %354 = arith.addf %349, %353 : vector<2x128xf32>
    %cst_157 = arith.constant 0.000000e+00 : f32
    %355 = vector.broadcast %cst_157 : f32 to vector<2x128xf32>
    %356 = arith.maximumf %354, %355 : vector<2x128xf32>
    %357 = vector.broadcast %77 : f32 to vector<2x128xf32>
    %358 = arith.mulf %357, %356 : vector<2x128xf32>
    %359 = arith.addf %313, %358 : vector<2x128xf32>
    %360 = vector.extract_strided_slice %82 {offsets = [0, 0, 0], sizes = [1, 2, 128], strides = [1, 1, 1]} : vector<4x2x128xf32> to vector<1x2x128xf32>
    %361 = vector.shape_cast %360 : vector<1x2x128xf32> to vector<2x128xf32>
    %362 = vector.broadcast %24 : f32 to vector<2x128xf32>
    %363 = arith.mulf %362, %361 : vector<2x128xf32>
    %364 = vector.broadcast %38 : f32 to vector<2x128xf32>
    %365 = arith.addf %364, %363 : vector<2x128xf32>
    %366 = vector.extract_strided_slice %82 {offsets = [1, 0, 0], sizes = [1, 2, 128], strides = [1, 1, 1]} : vector<4x2x128xf32> to vector<1x2x128xf32>
    %367 = vector.shape_cast %366 : vector<1x2x128xf32> to vector<2x128xf32>
    %368 = vector.broadcast %25 : f32 to vector<2x128xf32>
    %369 = arith.mulf %368, %367 : vector<2x128xf32>
    %370 = arith.addf %365, %369 : vector<2x128xf32>
    %371 = vector.extract_strided_slice %82 {offsets = [2, 0, 0], sizes = [1, 2, 128], strides = [1, 1, 1]} : vector<4x2x128xf32> to vector<1x2x128xf32>
    %372 = vector.shape_cast %371 : vector<1x2x128xf32> to vector<2x128xf32>
    %373 = vector.broadcast %26 : f32 to vector<2x128xf32>
    %374 = arith.mulf %373, %372 : vector<2x128xf32>
    %375 = arith.addf %370, %374 : vector<2x128xf32>
    %376 = vector.extract_strided_slice %82 {offsets = [3, 0, 0], sizes = [1, 2, 128], strides = [1, 1, 1]} : vector<4x2x128xf32> to vector<1x2x128xf32>
    %377 = vector.shape_cast %376 : vector<1x2x128xf32> to vector<2x128xf32>
    %378 = vector.broadcast %27 : f32 to vector<2x128xf32>
    %379 = arith.mulf %378, %377 : vector<2x128xf32>
    %380 = arith.addf %375, %379 : vector<2x128xf32>
    %381 = vector.extract_strided_slice %84 {offsets = [0, 0, 0], sizes = [1, 2, 128], strides = [1, 1, 1]} : vector<4x2x128xf32> to vector<1x2x128xf32>
    %382 = vector.shape_cast %381 : vector<1x2x128xf32> to vector<2x128xf32>
    %383 = vector.broadcast %64 : f32 to vector<2x128xf32>
    %384 = arith.mulf %383, %382 : vector<2x128xf32>
    %385 = arith.addf %380, %384 : vector<2x128xf32>
    %386 = vector.extract_strided_slice %84 {offsets = [1, 0, 0], sizes = [1, 2, 128], strides = [1, 1, 1]} : vector<4x2x128xf32> to vector<1x2x128xf32>
    %387 = vector.shape_cast %386 : vector<1x2x128xf32> to vector<2x128xf32>
    %388 = vector.broadcast %65 : f32 to vector<2x128xf32>
    %389 = arith.mulf %388, %387 : vector<2x128xf32>
    %390 = arith.addf %385, %389 : vector<2x128xf32>
    %391 = vector.extract_strided_slice %84 {offsets = [2, 0, 0], sizes = [1, 2, 128], strides = [1, 1, 1]} : vector<4x2x128xf32> to vector<1x2x128xf32>
    %392 = vector.shape_cast %391 : vector<1x2x128xf32> to vector<2x128xf32>
    %393 = vector.broadcast %66 : f32 to vector<2x128xf32>
    %394 = arith.mulf %393, %392 : vector<2x128xf32>
    %395 = arith.addf %390, %394 : vector<2x128xf32>
    %396 = vector.extract_strided_slice %84 {offsets = [3, 0, 0], sizes = [1, 2, 128], strides = [1, 1, 1]} : vector<4x2x128xf32> to vector<1x2x128xf32>
    %397 = vector.shape_cast %396 : vector<1x2x128xf32> to vector<2x128xf32>
    %398 = vector.broadcast %67 : f32 to vector<2x128xf32>
    %399 = arith.mulf %398, %397 : vector<2x128xf32>
    %400 = arith.addf %395, %399 : vector<2x128xf32>
    %cst_158 = arith.constant 0.000000e+00 : f32
    %401 = vector.broadcast %cst_158 : f32 to vector<2x128xf32>
    %402 = arith.maximumf %400, %401 : vector<2x128xf32>
    %403 = vector.broadcast %78 : f32 to vector<2x128xf32>
    %404 = arith.mulf %403, %402 : vector<2x128xf32>
    %405 = arith.addf %359, %404 : vector<2x128xf32>
    %406 = vector.extract_strided_slice %82 {offsets = [0, 0, 0], sizes = [1, 2, 128], strides = [1, 1, 1]} : vector<4x2x128xf32> to vector<1x2x128xf32>
    %407 = vector.shape_cast %406 : vector<1x2x128xf32> to vector<2x128xf32>
    %408 = vector.broadcast %28 : f32 to vector<2x128xf32>
    %409 = arith.mulf %408, %407 : vector<2x128xf32>
    %410 = vector.broadcast %39 : f32 to vector<2x128xf32>
    %411 = arith.addf %410, %409 : vector<2x128xf32>
    %412 = vector.extract_strided_slice %82 {offsets = [1, 0, 0], sizes = [1, 2, 128], strides = [1, 1, 1]} : vector<4x2x128xf32> to vector<1x2x128xf32>
    %413 = vector.shape_cast %412 : vector<1x2x128xf32> to vector<2x128xf32>
    %414 = vector.broadcast %29 : f32 to vector<2x128xf32>
    %415 = arith.mulf %414, %413 : vector<2x128xf32>
    %416 = arith.addf %411, %415 : vector<2x128xf32>
    %417 = vector.extract_strided_slice %82 {offsets = [2, 0, 0], sizes = [1, 2, 128], strides = [1, 1, 1]} : vector<4x2x128xf32> to vector<1x2x128xf32>
    %418 = vector.shape_cast %417 : vector<1x2x128xf32> to vector<2x128xf32>
    %419 = vector.broadcast %30 : f32 to vector<2x128xf32>
    %420 = arith.mulf %419, %418 : vector<2x128xf32>
    %421 = arith.addf %416, %420 : vector<2x128xf32>
    %422 = vector.extract_strided_slice %82 {offsets = [3, 0, 0], sizes = [1, 2, 128], strides = [1, 1, 1]} : vector<4x2x128xf32> to vector<1x2x128xf32>
    %423 = vector.shape_cast %422 : vector<1x2x128xf32> to vector<2x128xf32>
    %424 = vector.broadcast %31 : f32 to vector<2x128xf32>
    %425 = arith.mulf %424, %423 : vector<2x128xf32>
    %426 = arith.addf %421, %425 : vector<2x128xf32>
    %427 = vector.extract_strided_slice %84 {offsets = [0, 0, 0], sizes = [1, 2, 128], strides = [1, 1, 1]} : vector<4x2x128xf32> to vector<1x2x128xf32>
    %428 = vector.shape_cast %427 : vector<1x2x128xf32> to vector<2x128xf32>
    %429 = vector.broadcast %68 : f32 to vector<2x128xf32>
    %430 = arith.mulf %429, %428 : vector<2x128xf32>
    %431 = arith.addf %426, %430 : vector<2x128xf32>
    %432 = vector.extract_strided_slice %84 {offsets = [1, 0, 0], sizes = [1, 2, 128], strides = [1, 1, 1]} : vector<4x2x128xf32> to vector<1x2x128xf32>
    %433 = vector.shape_cast %432 : vector<1x2x128xf32> to vector<2x128xf32>
    %434 = vector.broadcast %69 : f32 to vector<2x128xf32>
    %435 = arith.mulf %434, %433 : vector<2x128xf32>
    %436 = arith.addf %431, %435 : vector<2x128xf32>
    %437 = vector.extract_strided_slice %84 {offsets = [2, 0, 0], sizes = [1, 2, 128], strides = [1, 1, 1]} : vector<4x2x128xf32> to vector<1x2x128xf32>
    %438 = vector.shape_cast %437 : vector<1x2x128xf32> to vector<2x128xf32>
    %439 = vector.broadcast %70 : f32 to vector<2x128xf32>
    %440 = arith.mulf %439, %438 : vector<2x128xf32>
    %441 = arith.addf %436, %440 : vector<2x128xf32>
    %442 = vector.extract_strided_slice %84 {offsets = [3, 0, 0], sizes = [1, 2, 128], strides = [1, 1, 1]} : vector<4x2x128xf32> to vector<1x2x128xf32>
    %443 = vector.shape_cast %442 : vector<1x2x128xf32> to vector<2x128xf32>
    %444 = vector.broadcast %71 : f32 to vector<2x128xf32>
    %445 = arith.mulf %444, %443 : vector<2x128xf32>
    %446 = arith.addf %441, %445 : vector<2x128xf32>
    %cst_159 = arith.constant 0.000000e+00 : f32
    %447 = vector.broadcast %cst_159 : f32 to vector<2x128xf32>
    %448 = arith.maximumf %446, %447 : vector<2x128xf32>
    %449 = vector.broadcast %79 : f32 to vector<2x128xf32>
    %450 = arith.mulf %449, %448 : vector<2x128xf32>
    %451 = arith.addf %405, %450 : vector<2x128xf32>
    %452 = vector.broadcast %80 : f32 to vector<2x128xf32>
    %453 = arith.addf %451, %452 : vector<2x128xf32>
    %cst_160 = arith.constant 5.000000e-01 : f32
    %454 = vector.broadcast %cst_160 : f32 to vector<2x128xf32>
    %455 = arith.mulf %454, %453 : vector<2x128xf32>
    %456 = math.tanh %455 : vector<2x128xf32>
    %cst_161 = arith.constant 5.000000e-01 : f32
    %457 = vector.broadcast %cst_161 : f32 to vector<2x128xf32>
    %458 = arith.mulf %457, %456 : vector<2x128xf32>
    %cst_162 = arith.constant 5.000000e-01 : f32
    %459 = vector.broadcast %cst_162 : f32 to vector<2x128xf32>
    %460 = arith.addf %458, %459 : vector<2x128xf32>
    %461 = vector.extract_strided_slice %84 {offsets = [0, 0, 0], sizes = [1, 2, 128], strides = [1, 1, 1]} : vector<4x2x128xf32> to vector<1x2x128xf32>
    %462 = vector.shape_cast %461 : vector<1x2x128xf32> to vector<2x128xf32>
    %463 = arith.mulf %460, %462 : vector<2x128xf32>
    %c0_163 = arith.constant 0 : index
    %c0_164 = arith.constant 0 : index
    %c0_165 = arith.constant 0 : index
    %c0_166 = arith.constant 0 : index
    %464 = vector.load %arg9[%c0_163, %c0_164, %c0_165, %c0_166] : memref<1x4x2x128xf32, #tpu.memory_space<vmem>>, vector<1x1x2x128xf32>
    %465 = vector.shape_cast %464 : vector<1x1x2x128xf32> to vector<2x128xf32>
    %466 = vector.shape_cast %463 : vector<2x128xf32> to vector<1x1x2x128xf32>
    tpu.vector_store %arg9[%c0_163, %c0_164, %c0_165, %c0_166], %466 {strides = array<i32>} : memref<1x4x2x128xf32, #tpu.memory_space<vmem>>, vector<1x1x2x128xf32>,
    %467 = vector.extract_strided_slice %84 {offsets = [1, 0, 0], sizes = [1, 2, 128], strides = [1, 1, 1]} : vector<4x2x128xf32> to vector<1x2x128xf32>
    %468 = vector.shape_cast %467 : vector<1x2x128xf32> to vector<2x128xf32>
    %469 = arith.mulf %460, %468 : vector<2x128xf32>
    %c0_167 = arith.constant 0 : index
    %c1_168 = arith.constant 1 : index
    %c0_169 = arith.constant 0 : index
    %c0_170 = arith.constant 0 : index
    %470 = vector.load %arg9[%c0_167, %c1_168, %c0_169, %c0_170] : memref<1x4x2x128xf32, #tpu.memory_space<vmem>>, vector<1x1x2x128xf32>
    %471 = vector.shape_cast %470 : vector<1x1x2x128xf32> to vector<2x128xf32>
    %472 = vector.shape_cast %469 : vector<2x128xf32> to vector<1x1x2x128xf32>
    tpu.vector_store %arg9[%c0_167, %c1_168, %c0_169, %c0_170], %472 {strides = array<i32>} : memref<1x4x2x128xf32, #tpu.memory_space<vmem>>, vector<1x1x2x128xf32>,
    %473 = vector.extract_strided_slice %84 {offsets = [2, 0, 0], sizes = [1, 2, 128], strides = [1, 1, 1]} : vector<4x2x128xf32> to vector<1x2x128xf32>
    %474 = vector.shape_cast %473 : vector<1x2x128xf32> to vector<2x128xf32>
    %475 = arith.mulf %460, %474 : vector<2x128xf32>
    %c0_171 = arith.constant 0 : index
    %c2_172 = arith.constant 2 : index
    %c0_173 = arith.constant 0 : index
    %c0_174 = arith.constant 0 : index
    %476 = vector.load %arg9[%c0_171, %c2_172, %c0_173, %c0_174] : memref<1x4x2x128xf32, #tpu.memory_space<vmem>>, vector<1x1x2x128xf32>
    %477 = vector.shape_cast %476 : vector<1x1x2x128xf32> to vector<2x128xf32>
    %478 = vector.shape_cast %475 : vector<2x128xf32> to vector<1x1x2x128xf32>
    tpu.vector_store %arg9[%c0_171, %c2_172, %c0_173, %c0_174], %478 {strides = array<i32>} : memref<1x4x2x128xf32, #tpu.memory_space<vmem>>, vector<1x1x2x128xf32>,
    %479 = vector.extract_strided_slice %84 {offsets = [3, 0, 0], sizes = [1, 2, 128], strides = [1, 1, 1]} : vector<4x2x128xf32> to vector<1x2x128xf32>
    %480 = vector.shape_cast %479 : vector<1x2x128xf32> to vector<2x128xf32>
    %481 = arith.mulf %460, %480 : vector<2x128xf32>
    %c0_175 = arith.constant 0 : index
    %c3_176 = arith.constant 3 : index
    %c0_177 = arith.constant 0 : index
    %c0_178 = arith.constant 0 : index
    %482 = vector.load %arg9[%c0_175, %c3_176, %c0_177, %c0_178] : memref<1x4x2x128xf32, #tpu.memory_space<vmem>>, vector<1x1x2x128xf32>
    %483 = vector.shape_cast %482 : vector<1x1x2x128xf32> to vector<2x128xf32>
    %484 = vector.shape_cast %481 : vector<2x128xf32> to vector<1x1x2x128xf32>
    tpu.vector_store %arg9[%c0_175, %c3_176, %c0_177, %c0_178], %484 {strides = array<i32>} : memref<1x4x2x128xf32, #tpu.memory_space<vmem>>, vector<1x1x2x128xf32>,
    return
  }
  func.func @transform_0(%arg0: i32, %arg1: i32) -> (i32, i32, i32, i32) {
    %c0_i32 = arith.constant 0 : i32
    %c0_i32_0 = arith.constant 0 : i32
    %c0_i32_1 = arith.constant 0 : i32
    return %arg0, %c0_i32, %arg1, %c0_i32_0 : i32, i32, i32, i32
  }
  func.func @transform_1(%arg0: i32, %arg1: i32) -> (i32, i32, i32, i32) {
    %c0_i32 = arith.constant 0 : i32
    %c0_i32_0 = arith.constant 0 : i32
    %c0_i32_1 = arith.constant 0 : i32
    return %arg0, %c0_i32, %arg1, %c0_i32_0 : i32, i32, i32, i32
  }
  func.func @transform_2(%arg0: i32, %arg1: i32) -> (i32, i32) {
    %c0_i32 = arith.constant 0 : i32
    %c0_i32_0 = arith.constant 0 : i32
    %c0_i32_1 = arith.constant 0 : i32
    return %c0_i32, %c0_i32_0 : i32, i32
  }
  func.func @transform_3(%arg0: i32, %arg1: i32) -> i32 {
    %c0_i32 = arith.constant 0 : i32
    %c0_i32_0 = arith.constant 0 : i32
    return %c0_i32 : i32
  }
  func.func @transform_4(%arg0: i32, %arg1: i32) -> (i32, i32) {
    %c0_i32 = arith.constant 0 : i32
    %c0_i32_0 = arith.constant 0 : i32
    %c0_i32_1 = arith.constant 0 : i32
    return %c0_i32, %c0_i32_0 : i32, i32
  }
  func.func @transform_5(%arg0: i32, %arg1: i32) -> (i32, i32) {
    %c0_i32 = arith.constant 0 : i32
    %c0_i32_0 = arith.constant 0 : i32
    %c0_i32_1 = arith.constant 0 : i32
    return %c0_i32, %c0_i32_0 : i32, i32
  }
  func.func @transform_6(%arg0: i32, %arg1: i32) -> i32 {
    %c0_i32 = arith.constant 0 : i32
    %c0_i32_0 = arith.constant 0 : i32
    return %c0_i32 : i32
  }
  func.func @transform_7(%arg0: i32, %arg1: i32) -> (i32, i32, i32, i32) {
    %c0_i32 = arith.constant 0 : i32
    %c0_i32_0 = arith.constant 0 : i32
    %c0_i32_1 = arith.constant 0 : i32
    return %arg0, %c0_i32, %arg1, %c0_i32_0 : i32, i32, i32, i32
  }
}

</mosaic_0001>

<bundles_post_ra>
// kernel: attention_gate.1
= control target key start
LH: loop header
LB: loop body
LE: loop exit
PB: predicated region body
PF: predicated region fallthrough
CT: control target
= control target key end

     0   :  { %s1705_s0 = inlined_call_operand.vmem [shape: f32[2,4,2,128], index: 0, kind: input, shape index: {}]   ;;  %s1706_s1 = inlined_call_operand.vmem [shape: f32[2,4,2,128], index: 1, kind: input, shape index: {}]   ;;  %s1707_s2 = inlined_call_operand.vmem [shape: f32[8,4], index: 2, kind: input, shape index: {}]   ;;  %s1708_s3 = inlined_call_operand.vmem [shape: f32[8], index: 3, kind: input, shape index: {}]   ;;  %s1709_s4 = inlined_call_operand.vmem [shape: f32[8,4], index: 4, kind: input, shape index: {}]   ;;  %s1710_s5 = inlined_call_operand.vmem [shape: f32[1,8], index: 5, kind: input, shape index: {}]   ;;  %s1711_s6 = inlined_call_operand.<no memory space> [shape: f32[1], index: 6, kind: input, shape index: {}]   ;;  %s1712_s7 = inlined_call_operand.vmem [shape: f32[2,4,2,128], index: 7, kind: output, shape index: {}]  }
   0x1   :  { %1716 = sst [smem:[#allocation13_spill]] %s1705_s0 }
   0x2   :  { %1717 = sst [smem:[#allocation14_spill]] %s1707_s2 }
   0x3   :  { %1718 = sst [smem:[#allocation15_spill]] %s1708_s3 }
   0x4   :  { %1719 = sst [smem:[#allocation16_spill]] %s1709_s4 }
   0x5   :  { %1720 = sst [smem:[#allocation17_spill]] %s1710_s5 }
   0x6   :  { %12 = sst [smem:[#allocation2]] %s1711_s6 }
   0x7   :  { %13 = vsyncpa [#allocation4], 0 }
   0x8   :  { %14 = vsyncpa [#allocation6], 0 }
   0x9   :  { %15 = vsyncpa [#allocation9], 0  ;;  %s1187_s26 = smov 0   ;;  %s1189_s27 = smov 0  }
   0xa   :  { %s1191_s28 = smov 0  }
   0xb LB: > { %s1721_s3 = sld [smem:[#allocation15_spill]]  ;;  %s874_s8 = sadd.s32 4294967295, %s1138_s28   ;;  %s1138_s28 = sphi %s1191_s28, %s21_s28   ;;  %s1134_s27 = sphi %s1189_s27, %s1733_s27   ;;  %s1130_s26 = sphi %s1187_s26, %s1732_s26  }
   0xc   : > { %p876_p0 = scmp.ge.s32.totalorder %s1138_s28, 1  ;;  %p227_p1 = scmp.lt.s32.totalorder %s1138_s28, 3 }
   0xd   : > { %p1208_p2 = scmp.eq.s32.totalorder %s874_s8, 0  ;;  %s33_s11 = sadd.s32 1, %s1134_s27 }
   0xe   : > { %p1212_p3 = pnand %p876_p0, %p227_p1  ;;  %s1724_s2 = sld [smem:[#allocation14_spill]] }
   0xf   : > { %s1722_s9 = scalar_select %p1208_p2, 1, 0 }
  0x10   : > { %s1723_s10 = scalar_select %p1212_p3, 1, 0 }
  0x11   : > { %s251_s30 = sshll.u32 %s1721_s3, 4  ;;  %p993_p4 = pneg %p1212_p3  ;;  %s252_s30 = int_to_ptr.vmem [resolvable:$true] %s251_s30 }
  0x12   : > { %p1228_p6 = scmp.ge.s32.totalorder %s33_s11, 2  ;;  %s1727_s4 = sld [smem:[#allocation16_spill]] }
  0x13   : > { %p1224_p5 = pnand %p1208_p2, %p993_p4  ;;  %s1044_s20 = scalar_lea.vmem %s252_s30, 16 }
  0x14   : > { %s240_s14 = sshll.u32 %s1724_s2, 4  ;;  %p1045_p7 = scmp.ne.s32.totalorder %s252_s30, %s1044_s20  ;;  %s241_s14 = int_to_ptr.vmem [resolvable:$true] %s240_s14 }
  0x15   : > { %p1046_p8 = pneg %p1224_p5  ;;  %p1052_p11 = scmp.lt.s32.totalorder %s252_s30, %s252_s30 }
  0x16   : > { %p1053_p12 = scmp.lt.s32.totalorder %s1044_s20, %s1044_s20 }
  0x17   : > { %p1047_p9 = pnand %p1046_p8, %p1045_p7 }
  0x18   : > { %s262_s19 = sshll.u32 %s1727_s4, 4  ;;  %p1054_p13 = por %p1053_p12, %p1052_p11  ;;  %s263_s19 = int_to_ptr.vmem [resolvable:$true] %s262_s19 }
  0x19   : > { %p1048_p10 = pneg %p1047_p9 }
  0x1b   : > { %p1055_p0 = pnand %p1054_p13, %p1048_p10 }
  0x1d   : > { %1058 = shalt.err (!%p1055_p0)
}
  0x1e   : > { %s1140_s21 = smov [#allocation5]   ;;  %s1735_s11 = smov (%p1228_p6, %s33_s11), 0 }
  0x1f   : > { %999 = dma.vmem_to_smem (!%p1224_p5), %s252_s30, 16, %s1140_s21, [#allocation6]  }
  0x20   : > { %s1059_s22 = scalar_lea.vmem %s241_s14, 128  ;;  %p1067_p9 = scmp.lt.s32.totalorder %s241_s14, %s241_s14 }
  0x21   : > { %p1060_p1 = scmp.ne.s32.totalorder %s241_s14, %s1059_s22  ;;  %p1068_p2 = scmp.lt.s32.totalorder %s1059_s22, %s1059_s22 }
  0x23   : > { %p1062_p4 = pnand %p1060_p1, %p1046_p8  ;;  %p1069_p11 = por %p1068_p2, %p1067_p9 }
  0x25   : > { %p1063_p7 = pneg %p1062_p4 }
  0x27   : > { %p1070_p10 = pnand %p1069_p11, %p1063_p7 }
  0x29   : > { %1073 = shalt.err (!%p1070_p10)
}
  0x2a   : > { %s1141_s23 = smov [#allocation3]   ;;  %s1074_s24 = scalar_lea.vmem %s263_s19, 128 }
  0x2b   : > { %996 = dma.vmem_to_smem (!%p1224_p5), %s241_s14, 128, %s1141_s23, [#allocation4]  }
  0x2c   : > { %p1075_p6 = scmp.ne.s32.totalorder %s263_s19, %s1074_s24  ;;  %p1082_p0 = scmp.lt.s32.totalorder %s263_s19, %s263_s19 }
  0x2d   : > { %p1083_p1 = scmp.lt.s32.totalorder %s1074_s24, %s1074_s24 }
  0x2e   : > { %p1077_p12 = pnand %p1075_p6, %p1046_p8 }
  0x2f   : > { %p1084_p4 = por %p1083_p1, %p1082_p0 }
  0x30   : > { %p1078_p13 = pneg %p1077_p12 }
  0x32   : > { %p1085_p3 = pnand %p1084_p4, %p1078_p13 }
  0x34   : > { %1088 = shalt.err (!%p1085_p3)
}
  0x35   : > { %s1142_s25 = smov [#allocation7]   ;;  %s1728_s5 = sld [smem:[#allocation17_spill]] }
  0x36   : > { %1002 = dma.vmem_to_smem (!%p1224_p5), %s263_s19, 128, %s1142_s25, [#allocation6]  }
  0x3b   : > { %s273_s30 = sshll.u32 %s1728_s5, 4  ;;  %s274_s30 = int_to_ptr.vmem [resolvable:$true] %s273_s30 }
  0x3c   : > { %s1089_s8 = scalar_lea.vmem %s274_s30, 16  ;;  %p1097_p11 = scmp.lt.s32.totalorder %s274_s30, %s274_s30 }
  0x3d   : > { %p1090_p2 = scmp.ne.s32.totalorder %s274_s30, %s1089_s8  ;;  %p1098_p10 = scmp.lt.s32.totalorder %s1089_s8, %s1089_s8 }
  0x3f   : > { %p1092_p7 = pnand %p1090_p2, %p1046_p8  ;;  %p1099_p6 = por %p1098_p10, %p1097_p11 }
  0x41   : > { %p1093_p9 = pneg %p1092_p7 }
  0x43   : > { %p1100_p3 = pnand %p1099_p6, %p1093_p9 }
  0x45   : > { %1103 = shalt.err (!%p1100_p3)
}
  0x46   : > { %s1143_s12 = smov [#allocation8]   ;;  %p1729_p12 = scmp.ne.s32.totalorder %s1723_s10, 0 }
  0x47   : > { %1005 = dma.vmem_to_smem (!%p1224_p5), %s274_s30, 16, %s1143_s12, [#allocation9]  }
  0x48   : > { %311 = sbr.rel (%p1729_p12) target bundleno = 187 (0xbb), region = 48  ;;  %p1730_p13 = scmp.ne.s32.totalorder (!%p1729_p12), %s1722_s9, 0 }
  0x4f   : > { %1117 = dma.done.wait (%p1730_p13), [#allocation4], 128  }
  0x50   : > { %1119 = vsyncadd (%p1730_p13), [#allocation4], 4294967168 }
  0x51   : > { %1121 = dma.done.wait (%p1730_p13), [#allocation6], 144  }
  0x52   : > { %1123 = vsyncadd (%p1730_p13), [#allocation6], 4294967152 }
  0x53   : > { %1125 = dma.done.wait (%p1730_p13), [#allocation9], 16  }
  0x54   : > { %1127 = vsyncadd (%p1730_p13), [#allocation9], 4294967280 }
  0x55   : > { %329 = sfence }
  0x56   : > { %p370_p5 = scmp.lt.s32.totalorder %s1130_s26, 1  ;;  %s1279_s10 = sld [smem:[#allocation3]] }
  0x57   : > { %s1282_s13 = sld [smem:[#allocation3 + $0x1]]  ;;  %s1284_s14 = sld [smem:[#allocation3 + $0x2]] }
  0x58   : > { %s1737_s26 = smov (!%p370_p5, %s1130_s26), 1  ;;  %s1288_s16 = sld [smem:[#allocation3 + $0x3]] }
  0x59   : > { %s1286_s15 = sshll.u32 %s1737_s26, 3  ;;  %s1290_s17 = sld [smem:[#allocation3 + $0x80]] }
  0x5a   : > { %s1292_s9 = sld [smem:[#allocation3 + $0x81]]  ;;  %s1731_s0 = sld [smem:[#allocation13_spill]] }
  0x5b   : > { %s1298_s21 = sld [smem:[#allocation3 + $0x82]]  ;;  %s1300_s22 = sld [smem:[#allocation3 + $0x83]] }
  0x5c   : > { %s1302_s23 = sld [smem:[#allocation3 + $0x100]]  ;;  %s1304_s26 = sld [smem:[#allocation3 + $0x101]]  ;;  %v483_v2 = vstv %s1279_s10 }
  0x5d   : > { %s1306_s24 = sld [smem:[#allocation3 + $0x102]]  ;;  %s1308_s25 = sld [smem:[#allocation3 + $0x103]]  ;;  %v487_v5 = vstv %s1282_s13  ;;  %v490_v6 = vstv %s1284_s14 }
  0x5e   : > { %s1310_s6 = sld [smem:[#allocation3 + $0x180]]  ;;  %s1312_s29 = sld [smem:[#allocation3 + $0x181]]  ;;  %v493_v7 = vstv %s1288_s16 }
  0x5f   : > { %s1314_s30 = sld [smem:[#allocation3 + $0x182]]  ;;  %s1318_s8 = sld [smem:[#allocation3 + $0x183]]  ;;  %v511_v9 = vstv %s1290_s17 }
  0x60   : > { %s377_s20 = scalar_lea.vmem %s1731_s0, %s1286_s15  ;;  %s1320_s12 = sld [smem:[#allocation3 + $0x200]]  ;;  %v515_v10 = vstv %s1292_s9 }
  0x61   : > { %v1316_v0 = vld [vmem:[%s377_s20] sm:$0x3]  ;;  %v1322_v1 = vld [vmem:[%s377_s20 + $0x2] sm:$0x3]  ;;  %s1325_s18 = sld [smem:[#allocation3 + $0x201]]  ;;  %s1327_s19 = sld [smem:[#allocation3 + $0x202]]  ;;  %v518_v11 = vstv %s1298_s21  ;;  %v521_v12 = vstv %s1300_s22 }
  0x62   : > { %v1329_v3 = vld [vmem:[%s377_s20 + $0x4] sm:$0x3]  ;;  %s1331_s0 = sld [smem:[#allocation3 + $0x203]]  ;;  %s1333_s2 = sld [smem:[#allocation3 + $0x280]]  ;;  %v1335_v4 = vld [vmem:[%s377_s20 + $0x6] sm:$0x3]  ;;  %v1345_v8 = vmul.f32 %v483_v2, %v1316_v0  ;;  %v540_v13 = vstv %s1302_s23  ;;  %v544_v14 = vstv %s1304_s26  ;;  %v1359_v16 = vmul.f32 %v487_v5, %v1322_v1 }
  0x63   : > { %s1340_s10 = sld [smem:[#allocation3 + $0x281]]  ;;  %s1342_s3 = sld [smem:[#allocation3 + $0x282]]  ;;  %v547_v15 = vstv %s1306_s24  ;;  %v1362_v17 = vmul.f32 %v490_v6, %v1329_v3  ;;  %v1365_v18 = vmul.f32 %v493_v7, %v1335_v4  ;;  %v550_v19 = vstv %s1308_s25 }
  0x64   : > { %s1350_s4 = sld [smem:[#allocation3 + $0x283]]  ;;  %s1352_s5 = sld [smem:[#allocation3 + $0x300]]  ;;  %v512_v20 = vmul.f32 %v511_v9, %v1316_v0  ;;  %v1374_v21 = vmul.f32 %v515_v10, %v1322_v1  ;;  %v1377_v22 = vmul.f32 %v518_v11, %v1329_v3  ;;  %v569_v23 = vstv %s1310_s6 }
  0x65   : > { %s1368_s13 = sld [smem:[#allocation3 + $0x301]]  ;;  %s1370_s14 = sld [smem:[#allocation3 + $0x302]]  ;;  %v1381_v24 = vmul.f32 %v521_v12, %v1335_v4  ;;  %v541_v25 = vmul.f32 %v540_v13, %v1316_v0  ;;  %v1385_v26 = vmul.f32 %v544_v14, %v1322_v1  ;;  %v1388_v27 = vmul.f32 %v547_v15, %v1329_v3 }
  0x66   : > { %s1390_s16 = sld [smem:[#allocation5]]  ;;  %v1393_v28 = vmul.f32 %v550_v19, %v1335_v4  ;;  %v573_v29 = vstv %s1312_s29  ;;  %v576_v30 = vstv %s1314_s30  ;;  %v579_v31 = vstv %s1318_s8  ;;  %s1398_s17 = sld [smem:[#allocation5 + $0x1]] }
  0x67   : > { %s1400_s9 = sld [smem:[#allocation5 + $0x2]]  ;;  %v570_v32 = vmul.f32 %v569_v23, %v1316_v0  ;;  %v598_v33 = vstv %s1320_s12  ;;  %v602_v34 = vstv %s1325_s18  ;;  %v605_v35 = vstv %s1327_s19  ;;  %s1406_s20 = sld [smem:[#allocation5 + $0x3]] }
  0x68   : > { %s1408_s21 = sld [smem:[#allocation5 + $0x4]]  ;;  %v608_v36 = vstv %s1331_s0  ;;  %v627_v37 = vstv %s1333_s2  ;;  %v1415_v40 = vmul.f32 %v573_v29, %v1322_v1  ;;  %v1418_v41 = vmul.f32 %v576_v30, %v1329_v3  ;;  %s1428_s26 = scalar_lea.vmem %s1706_s1, %s1286_s15 }
  0x69   : > { %v631_v38 = vstv %s1340_s10  ;;  %v634_v39 = vstv %s1342_s3  ;;  %v1421_v42 = vmul.f32 %v579_v31, %v1335_v4  ;;  %s1430_s0 = sld [smem:[#allocation7]]  ;;  %v599_v44 = vmul.f32 %v598_v33, %v1316_v0  ;;  %s1440_s2 = sld [smem:[#allocation7 + $0x1]]  ;;  %v1481_v60 = vld [vmem:[%s1428_s26] sm:$0x3]  ;;  %v1488_v5 = vld [vmem:[%s1428_s26 + $0x2] sm:$0x3] }
  0x6a   : > { %v637_v43 = vstv %s1350_s4  ;;  %v1434_v45 = vmul.f32 %v602_v34, %v1322_v1  ;;  %v1437_v46 = vmul.f32 %v605_v35, %v1329_v3  ;;  %v656_v47 = vstv %s1352_s5  ;;  %s1442_s3 = sld [smem:[#allocation7 + $0x2]]  ;;  %s1456_s4 = sld [smem:[#allocation7 + $0x3]]  ;;  %v1491_v6 = vld [vmem:[%s1428_s26 + $0x4] sm:$0x3]  ;;  %v1505_v11 = vld [vmem:[%s1428_s26 + $0x6] sm:$0x3] }
  0x6b   : > { %v1445_v48 = vmul.f32 %v608_v36, %v1335_v4  ;;  %v1448_v49 = vmul.f32 %v627_v37, %v1316_v0  ;;  %v1451_v50 = vmul.f32 %v631_v38, %v1322_v1  ;;  %v1454_v51 = vmul.f32 %v634_v39, %v1329_v3  ;;  %s1458_s5 = sld [smem:[#allocation7 + $0x80]]  ;;  %s1466_s24 = sld [smem:[#allocation7 + $0x81]] }
  0x6c   : > { %v485_v52 = vstv %s1390_s16  ;;  %v1462_v53 = vmul.f32 %v637_v43, %v1335_v4  ;;  %v660_v54 = vstv %s1368_s13  ;;  %v663_v55 = vstv %s1370_s14  ;;  %s1468_s25 = sld [smem:[#allocation7 + $0x82]]  ;;  %s1476_s6 = sld [smem:[#allocation7 + $0x83]] }
  0x6d   : > { %v486_v56 = vadd.f32 %v485_v52, %v1345_v8  ;;  %v513_v57 = vstv %s1398_s17  ;;  %v542_v58 = vstv %s1400_s9  ;;  %v1474_v59 = vmul.f32 %v656_v47, %v1316_v0  ;;  %s1478_s29 = sld [smem:[#allocation7 + $0x100]]  ;;  %s1485_s30 = sld [smem:[#allocation7 + $0x101]] }
  0x6e   : > { %v514_v61 = vadd.f32 %v513_v57, %v512_v20  ;;  %v543_v62 = vadd.f32 %v542_v58, %v541_v25  ;;  %v571_v63 = vstv %s1406_s20  ;;  %v600_v2 = vstv %s1408_s21  ;;  %s1500_s8 = sld [smem:[#allocation7 + $0x102]]  ;;  %s1502_s12 = sld [smem:[#allocation7 + $0x103]] }
  0x6f   : > { %v489_v7 = vadd.f32 %v1359_v16, %v486_v56  ;;  %v572_v8 = vadd.f32 %v571_v63, %v570_v32  ;;  %v1495_v9 = vmul.f32 %v660_v54, %v1322_v1  ;;  %v1498_v10 = vmul.f32 %v663_v55, %v1329_v3  ;;  %s1516_s18 = sld [smem:[#allocation7 + $0x180]]  ;;  %s1518_s19 = sld [smem:[#allocation7 + $0x181]] }
  0x70   : > { %v496_v12 = vstv %s1430_s0  ;;  %v517_v13 = vadd.f32 %v1374_v21, %v514_v61  ;;  %v546_v14 = vadd.f32 %v1385_v26, %v543_v62  ;;  %v1510_v15 = vadd.f32 %v600_v2, %v599_v44  ;;  %s1528_s10 = sld [smem:[#allocation7 + $0x182]]  ;;  %s1530_s13 = sld [smem:[#allocation7 + $0x183]] }
  0x71   : > { %v492_v16 = vadd.f32 %v1362_v17, %v489_v7  ;;  %v497_v19 = vmul.f32 %v496_v12, %v1481_v60  ;;  %v499_v20 = vstv %s1440_s2  ;;  %v502_v23 = vstv %s1442_s3  ;;  %s1536_s14 = sld [smem:[#allocation3 + $0x303]]  ;;  %s1538_s16 = sld [smem:[#allocation5 + $0x5]] }
  0x72   : > { %v500_v25 = vmul.f32 %v499_v20, %v1488_v5  ;;  %v503_v21 = vmul.f32 %v502_v23, %v1491_v6  ;;  %v505_v29 = vstv %s1456_s4  ;;  %v520_v26 = vadd.f32 %v1377_v22, %v517_v13  ;;  %s1543_s17 = sld [smem:[#allocation7 + $0x200]]  ;;  %s1548_s9 = sld [smem:[#allocation7 + $0x201]] }
  0x73   : > { %v495_v30 = vadd.f32 %v1365_v18, %v492_v16  ;;  %v506_v17 = vmul.f32 %v505_v29, %v1505_v11  ;;  %v524_v31 = vstv %s1458_s5  ;;  %v527_v32 = vstv %s1466_s24  ;;  %s1556_s20 = sld [smem:[#allocation3 + $0x380]]  ;;  %s1558_s21 = sld [smem:[#allocation7 + $0x202]] }
  0x74   : > { %v523_v33 = vadd.f32 %v1381_v24, %v520_v26  ;;  %v525_v34 = vmul.f32 %v524_v31, %v1481_v60  ;;  %v528_v35 = vmul.f32 %v527_v32, %v1488_v5  ;;  %v530_v36 = vstv %s1468_s25  ;;  %s1562_s22 = sld [smem:[#allocation7 + $0x203]]  ;;  %s1564_s23 = sld [smem:[#allocation8]] }
  0x75   : > { %v498_v18 = vadd.f32 %v497_v19, %v495_v30  ;;  %v531_v22 = vmul.f32 %v530_v36, %v1491_v6  ;;  %v533_v37 = vstv %s1476_s6  ;;  %v549_v38 = vadd.f32 %v1388_v27, %v546_v14  ;;  %s1569_s26 = sld [smem:[#allocation8 + $0x1]]  ;;  %s1571_s0 = sld [smem:[#allocation8 + $0x2]] }
  0x76   : > { %v526_v24 = vadd.f32 %v525_v34, %v523_v33  ;;  %v534_v39 = vmul.f32 %v533_v37, %v1505_v11  ;;  %v553_v43 = vstv %s1478_s29  ;;  %v556_v44 = vstv %s1485_s30  ;;  %s1578_s2 = sld [smem:[#allocation3 + $0x381]]  ;;  %s1580_s3 = sld [smem:[#allocation7 + $0x280]] }
  0x77   : > { %v501_v47 = vadd.f32 %v500_v25, %v498_v18  ;;  %v552_v52 = vadd.f32 %v1393_v28, %v549_v38  ;;  %v554_v54 = vmul.f32 %v553_v43, %v1481_v60  ;;  %v557_v55 = vmul.f32 %v556_v44, %v1488_v5  ;;  %s1584_s4 = sld [smem:[#allocation3 + $0x382]]  ;;  %s1586_s5 = sld [smem:[#allocation7 + $0x281]] }
  0x78   : > { %v529_v56 = vadd.f32 %v528_v35, %v526_v24  ;;  %v559_v27 = vstv %s1500_s8  ;;  %v562_v57 = vstv %s1502_s12  ;;  %v575_v58 = vadd.f32 %v1415_v40, %v572_v8  ;;  %s1592_s24 = sld [smem:[#allocation8 + $0x3]]  ;;  %s1596_s25 = sld [smem:[#allocation7 + $0x282]] }
  0x79   : > { %v504_v61 = vadd.f32 %v503_v21, %v501_v47  ;;  %v555_v62 = vadd.f32 %v554_v54, %v552_v52  ;;  %v560_v63 = vmul.f32 %v559_v27, %v1491_v6  ;;  %v563_v28 = vmul.f32 %v562_v57, %v1505_v11  ;;  %s1601_s6 = sld [smem:[#allocation5 + $0x6]]  ;;  %s1603_s29 = sld [smem:[#allocation7 + $0x283]] }
  0x7a   : > { %v532_v2 = vadd.f32 %v531_v22, %v529_v56  ;;  %v578_v7 = vadd.f32 %v1418_v41, %v575_v58  ;;  %v582_v40 = vstv %s1516_s18  ;;  %v585_v8 = vstv %s1518_s19  ;;  %s1614_s30 = sld [smem:[#allocation3 + $0x383]]  ;;  %s1616_s8 = sld [smem:[#allocation7 + $0x300]] }
  0x7b   : > { %v507_v12 = vadd.f32 %v506_v17, %v504_v61  ;;  %v558_v13 = vadd.f32 %v557_v55, %v555_v62  ;;  %v583_v14 = vmul.f32 %v582_v40, %v1481_v60  ;;  %v586_v16 = vmul.f32 %v585_v8, %v1488_v5  ;;  %s1621_s12 = sld [smem:[#allocation5 + $0x7]]  ;;  %s1623_s18 = sld [smem:[#allocation7 + $0x301]] }
  0x7c   : > { %v535_v19 = vadd.f32 %v534_v39, %v532_v2  ;;  %v581_v20 = vadd.f32 %v1421_v42, %v578_v7  ;;  %v588_v23 = vstv %s1528_s10  ;;  %v591_v41 = vstv %s1530_s13  ;;  %s1629_s19 = sld [smem:[#allocation8 + $0x4]]  ;;  %s1634_s10 = sld [smem:[#allocation7 + $0x302]] }
  0x7d   : > { %v508_v25 = vmax.f32 %v507_v12, 0.0  ;;  %v561_v21 = vadd.f32 %v560_v63, %v558_v13  ;;  %v629_v29 = vstv %s1538_s16  ;;  %v666_v26 = vstv %s1536_s14  ;;  %s1636_s13 = sld [smem:[#allocation7 + $0x380]]  ;;  %s1642_s14 = sld [smem:[#allocation7 + $0x303]] }
  0x7e   : > { %v584_v30 = vadd.f32 %v583_v14, %v581_v20  ;;  %v589_v42 = vmul.f32 %v588_v23, %v1491_v6  ;;  %v604_v17 = vadd.f32 %v1434_v45, %v1510_v15  ;;  %v611_v31 = vstv %s1543_s17  ;;  %s1644_s16 = sld [smem:[#allocation7 + $0x381]]  ;;  %s1653_s17 = sld [smem:[#allocation7 + $0x382]] }
  0x7f   : > { %v536_v32 = vmax.f32 %v535_v19, 0.0  ;;  %v564_v33 = vadd.f32 %v563_v28, %v561_v21  ;;  %v592_v34 = vmul.f32 %v591_v41, %v1505_v11  ;;  %v614_v35 = vstv %s1548_s9  ;;  %s1655_s9 = sld [smem:[#allocation8 + $0x5]] }
  0x80   : > { %v509_v36 = vstv %s1564_s23  ;;  %v587_v18 = vadd.f32 %v586_v16, %v584_v30  ;;  %v607_v22 = vadd.f32 %v1437_v46, %v604_v17  ;;  %v612_v37 = vmul.f32 %v611_v31, %v1481_v60  ;;  %s474_s23 = sld [smem:[#allocation2]] }
  0x81   : > { %v537_v45 = vstv %s1569_s26  ;;  %v617_v15 = vstv %s1558_s21  ;;  %v630_v38 = vadd.f32 %v629_v29, %v1448_v49  ;;  %v685_v24 = vstv %s1556_s20  ;;  %s1662_s20 = sld [smem:[#allocation7 + $0x383]]  ;;  %s1674_s21 = sld [smem:[#allocation8 + $0x6]] }
  0x82   : > { %v590_v39 = vadd.f32 %v589_v42, %v587_v18  ;;  %v610_v43 = vadd.f32 %v1445_v48, %v607_v22  ;;  %v615_v44 = vmul.f32 %v614_v35, %v1488_v5  ;;  %v1612_v46 = vmul.f32 %v666_v26, %v1335_v4 }
  0x83   : > { %v510_v47 = vmul.f32 %v509_v36, %v508_v25  ;;  %v565_v52 = vmax.f32 %v564_v33, 0.0  ;;  %v566_v54 = vstv %s1571_s0  ;;  %v620_v49 = vstv %s1562_s22  ;;  %s968_s22 = sld [smem:[#allocation8 + $0x7]] }
  0x84   : > { %v538_v55 = vmul.f32 %v537_v45, %v536_v32  ;;  %v593_v56 = vadd.f32 %v592_v34, %v590_v39  ;;  %v613_v48 = vadd.f32 %v612_v37, %v610_v43  ;;  %v618_v27 = vmul.f32 %v617_v15, %v1491_v6 }
  0x85   : > { %v633_v57 = vadd.f32 %v1451_v50, %v630_v38  ;;  %v640_v58 = vstv %s1580_s3  ;;  %v686_v61 = vmul.f32 %v685_v24, %v1316_v0  ;;  %v689_v62 = vstv %s1578_s2  ;;  %s393_s2 = scalar_lea.vmem %s1712_s7, %s1286_s15 }
  0x86   : > { %v616_v63 = vadd.f32 %v615_v44, %v613_v48  ;;  %v621_v28 = vmul.f32 %v620_v49, %v1505_v11  ;;  %v643_v2 = vstv %s1586_s5  ;;  %v692_v7 = vstv %s1584_s4 }
  0x87   : > { %v567_v40 = vmul.f32 %v566_v54, %v565_v52  ;;  %v595_v50 = vstv %s1592_s24  ;;  %v636_v8 = vadd.f32 %v1454_v51, %v633_v57  ;;  %v641_v0 = vmul.f32 %v640_v58, %v1481_v60 }
  0x88   : > { %v539_v12 = vadd.f32 %v538_v55, %v510_v47  ;;  %v594_v13 = vmax.f32 %v593_v56, 0.0  ;;  %v619_v14 = vadd.f32 %v618_v27, %v616_v63  ;;  %v646_v16 = vstv %s1596_s25 }
  0x89   : > { %v639_v19 = vadd.f32 %v1462_v53, %v636_v8  ;;  %v644_v20 = vmul.f32 %v643_v2, %v1488_v5  ;;  %v649_v23 = vstv %s1603_s29  ;;  %v658_v41 = vstv %s1601_s6 }
  0x8a   : > { %v622_v25 = vadd.f32 %v621_v28, %v619_v14  ;;  %v659_v51 = vadd.f32 %v658_v41, %v1474_v59  ;;  %v690_v21 = vmul.f32 %v689_v62, %v1322_v1  ;;  %v693_v29 = vmul.f32 %v692_v7, %v1329_v3 }
  0x8b   : > { %v642_v26 = vadd.f32 %v641_v0, %v639_v19  ;;  %v647_v53 = vmul.f32 %v646_v16, %v1491_v6  ;;  %v669_v30 = vstv %s1616_s8  ;;  %v695_v42 = vstv %s1614_s30 }
  0x8c   : > { %v568_v17 = vadd.f32 %v567_v40, %v539_v12  ;;  %v596_v59 = vmul.f32 %v595_v50, %v594_v13  ;;  %v650_v31 = vmul.f32 %v649_v23, %v1505_v11  ;;  %v662_v1 = vadd.f32 %v1495_v9, %v659_v51 }
  0x8d   : > { %v623_v3 = vmax.f32 %v622_v25, 0.0  ;;  %v645_v32 = vadd.f32 %v644_v20, %v642_v26  ;;  %v672_v33 = vstv %s1623_s18  ;;  %v687_v34 = vstv %s1621_s12 }
  0x8e   : > { %v624_v35 = vstv %s1629_s19  ;;  %v665_v36 = vadd.f32 %v1498_v10, %v662_v1  ;;  %v670_v18 = vmul.f32 %v669_v30, %v1481_v60  ;;  %v688_v22 = vadd.f32 %v687_v34, %v686_v61 }
  0x8f   : > { %v648_v37 = vadd.f32 %v647_v53, %v645_v32  ;;  %v675_v45 = vstv %s1634_s10  ;;  %v696_v15 = vmul.f32 %v695_v42, %v1335_v4  ;;  %v698_v9 = vstv %s1636_s13 }
  0x90   : > { %v597_v38 = vadd.f32 %v596_v59, %v568_v17  ;;  %v668_v24 = vadd.f32 %v1612_v46, %v665_v36  ;;  %v673_v39 = vmul.f32 %v672_v33, %v1488_v5  ;;  %v691_v43 = vadd.f32 %v690_v21, %v688_v22 }
  0x91   : > { %v625_v44 = vmul.f32 %v624_v35, %v623_v3  ;;  %v651_v10 = vadd.f32 %v650_v31, %v648_v37  ;;  %v678_v47 = vstv %s1642_s14  ;;  %v701_v52 = vstv %s1644_s16 }
  0x92   : > { %v671_v54 = vadd.f32 %v670_v18, %v668_v24  ;;  %v676_v49 = vmul.f32 %v675_v45, %v1491_v6  ;;  %v694_v4 = vadd.f32 %v693_v29, %v691_v43  ;;  %v699_v55 = vmul.f32 %v698_v9, %v1481_v60 }
  0x93   : > { %v652_v56 = vmax.f32 %v651_v10, 0.0  ;;  %v653_v48 = vstv %s1655_s9  ;;  %v704_v27 = vstv %s1653_s17  ;;  %v679_v57 = vmul.f32 %v678_v47, %v1505_v11 }
  0x94   : > { %v674_v46 = vadd.f32 %v673_v39, %v671_v54  ;;  %v697_v58 = vadd.f32 %v696_v15, %v694_v4  ;;  %v702_v61 = vmul.f32 %v701_v52, %v1488_v5  ;;  %v626_v62 = vadd.f32 %v625_v44, %v597_v38 }
  0x95   : > { %v707_v63 = vstv %s1662_s20  ;;  %v654_v28 = vmul.f32 %v653_v48, %v652_v56  ;;  %v705_v40 = vmul.f32 %v704_v27, %v1491_v6  ;;  %v682_v12 = vstv %s1674_s21 }
  0x96   : > { %v677_v2 = vadd.f32 %v676_v49, %v674_v46  ;;  %v700_v7 = vadd.f32 %v699_v55, %v697_v58  ;;  %v708_v0 = vmul.f32 %v707_v63, %v1505_v11  ;;  %v711_v23 = vstv %s968_s22 }
  0x97   : > { %v655_v13 = vadd.f32 %v654_v28, %v626_v62  ;;  %v714_v21 = vstv %s474_s23 }
  0x98   : > { %v680_v50 = vadd.f32 %v679_v57, %v677_v2  ;;  %v703_v8 = vadd.f32 %v702_v61, %v700_v7 }
  0x9a   : > { %v681_v14 = vmax.f32 %v680_v50, 0.0  ;;  %v706_v16 = vadd.f32 %v705_v40, %v703_v8 }
  0x9c   : > { %v683_v19 = vmul.f32 %v682_v12, %v681_v14  ;;  %v709_v20 = vadd.f32 %v708_v0, %v706_v16 }
  0x9e   : > { %v684_v41 = vadd.f32 %v683_v19, %v655_v13  ;;  %v710_v25 = vmax.f32 %v709_v20, 0.0 }
  0xa0   : > { %v712_v51 = vmul.f32 %v711_v23, %v710_v25 }
  0xa2   : > { %v713_v29 = vadd.f32 %v712_v51, %v684_v41 }
  0xa4   : > { %v715_v26 = vadd.f32 %v714_v21, %v713_v29 }
  0xa6   : > { %v716_v53 = vmul.f32 0.5, %v715_v26 }
  0xa8   : > { %1042 = vtanh.f32 %v716_v53 }
  0xb2   : > { %v1043_v30 = vpop.eup %1042 }
  0xb3   : > { %v718_v42 = vmul.f32 0.5, %v1043_v30 }
  0xb5   : > { %v719_v17 = vadd.f32 0.5, %v718_v42 }
  0xb7   : > { %v720_v59 = vmul.f32 %v719_v17, %v1481_v60  ;;  %v722_v31 = vmul.f32 %v719_v17, %v1488_v5  ;;  %v725_v1 = vmul.f32 %v719_v17, %v1491_v6  ;;  %v728_v3 = vmul.f32 %v719_v17, %v1505_v11 }
  0xb9   : > { %721 = vst [vmem:[%s393_s2] sm:$0x3] %v720_v59  ;;  %969 = vst [vmem:[%s393_s2 + $0x2] sm:$0x3] %v722_v31 }
  0xba   : > { %970 = vst [vmem:[%s393_s2 + $0x4] sm:$0x3] %v725_v1  ;;  %971 = vst [vmem:[%s393_s2 + $0x6] sm:$0x3] %v728_v3 }
  0xbb PF: > { %s21_s28 = sadd.s32 1, %s1138_s28   ;;  %s1732_s26 = smov %s1134_s27 }
  0xbc   : > { %p18_p8 = scmp.ge.s32.totalorder %s21_s28, 4   ;;  %s1733_s27 = smov %s1735_s11 }
  0xbe   :  { %20 = sbr.rel (!%p18_p8) target bundleno = 11 (0xb), region = 101 }
  0xc5   :  { %758 = vsyncpa [#allocation4], 1 }
  0xc6   :  { %760 = vsyncpa [#allocation4 + $0x1], 1 }
  0xc7   :  { %761 = vsyncpa [#allocation6], 1 }
  0xc8   :  { %762 = vsyncpa [#allocation9], 1 }

</bundles_post_ra>
